<compile_context>
chip_gen: v7x
topology: tpu7x:2x2x1
jax: 0.10.0
libtpu: 0.0.40
codegen_flags: <defaults>
</compile_context>

<pallas_src>
import jax
import jax.numpy as jnp
from jax.experimental import pallas as pl
from jax.experimental.pallas import tpu as pltpu

LANE = 128


def make_vae_kernel(xp, hp, zp):
    """xp/hp/zp are the lane-padded (multiple-of-128) feature dims."""

    def kernel(x_ref, eps_ref, w_xh_ref, w_muvar_ref, w_zh_ref, w_hx_ref,
               b_ref, out_ref):
        x = x_ref[...]            # [TB, xp]
        eps = eps_ref[...]        # [TB, zp]
        b = b_ref[...]            # [8, bw]  rows: b_xh, b_mu, b_var, b_zh, b_hx

        # encode (all bias slices start at lane 0, widths are multiples of 128)
        h = jnp.dot(x, w_xh_ref[...],
                    preferred_element_type=jnp.float32) + b[0:1, :hp]
        muvar = jnp.dot(h, w_muvar_ref[...],
                        preferred_element_type=jnp.float32)        # [TB, 2*zp]
        z_mu = muvar[:, :zp] + b[1:2, :zp]                         # 128-aligned split
        z_var = jax.nn.sigmoid(muvar[:, zp:] + b[2:3, :zp])        # EUP slot

        # sample_z (reparameterization; eps supplied from host for determinism)
        # pad lanes: z_mu = 0 and eps = 0 there, so z stays 0 in pad columns.
        z = z_mu + jnp.exp(z_var * 0.5) * eps

        # decode
        h2 = jnp.maximum(
            jnp.dot(z, w_zh_ref[...],
                    preferred_element_type=jnp.float32) + b[3:4, :hp], 0.0)
        logits = jnp.dot(h2, w_hx_ref[...],
                         preferred_element_type=jnp.float32) + b[4:5, :xp]
        # pad columns hold sigmoid(0)=0.5; the wrapper slices them off.
        out_ref[...] = jax.nn.sigmoid(logits)

    return kernel


def _pad2(a, rows, cols):
    r, c = a.shape
    return jnp.pad(a, ((0, rows - r), (0, cols - c)))


def pack_params(p, x_dim, h_dim, z_dim):
    """Pad all feature dims to 128 lanes, fuse the mu/var heads, and pack the
    five bias rows into one sublane/lane-aligned [8, bw] slab. Done once."""
    xp = pl.cdiv(x_dim, LANE) * LANE
    hp = pl.cdiv(h_dim, LANE) * LANE
    zp = pl.cdiv(z_dim, LANE) * LANE

    w_xh = _pad2(p["w_xh"], xp, hp)                         # [xp, hp]
    # mu occupies lanes [0, zp), var occupies [zp, 2*zp): 128-aligned split.
    w_muvar = jnp.concatenate([_pad2(p["w_mu"], hp, zp),
                               _pad2(p["w_var"], hp, zp)], axis=1)   # [hp, 2*zp]
    w_zh = _pad2(p["w_zh"], zp, hp)                         # [zp, hp]
    w_hx = _pad2(p["w_hx"], hp, xp)                         # [hp, xp]

    bw = max(xp, hp, zp)

    def row(b):
        return jnp.pad(b, ((0, 0), (0, bw - b.shape[1])))

    b_rows = jnp.concatenate(
        [row(p["b_xh"]), row(p["b_mu"]), row(p["b_var"]),
         row(p["b_zh"]), row(p["b_hx"])], axis=0)           # [5, bw]
    b_packed = jnp.pad(b_rows, ((0, 8 - b_rows.shape[0]), (0, 0)))   # [8, bw]

    return dict(w_xh=w_xh, w_muvar=w_muvar, w_zh=w_zh, w_hx=w_hx,
                b_packed=b_packed, dims=(xp, hp, zp))


def _default_tb(B):
    # Grid is a serial loop on single-TC chips (v5e/v6e): one step for small
    # batches removes per-step overhead. For B >= 512 use 128-row tiles so
    # v7x's two TensorCores each get >= 2 pipelined steps (DMA overlap);
    # the extra serial steps cost <1.5 us on single-TC chips.
    if B < 512:
        return max(8, ((B + 7) // 8) * 8)
    return 128


def bernoulli_vae_forward(x, eps, packed, *, tb=None):
    """x: [B, x_dim] f32, eps: [B, z_dim] f32, packed: output of pack_params."""
    B, x_dim = x.shape
    z_dim = eps.shape[1]
    xp, hp, zp = packed["dims"]

    # Lane-pad activations (tiny HBM copies; weight pad rows are zero so the
    # pad columns contribute nothing).
    if x_dim != xp:
        x = jnp.pad(x, ((0, 0), (0, xp - x_dim)))
    if z_dim != zp:
        eps = jnp.pad(eps, ((0, 0), (0, zp - z_dim)))

    TB = tb if tb is not None else _default_tb(B)
    B_pad = pl.cdiv(B, TB) * TB
    if B_pad != B:
        # Only hit for ragged batches; prefer a TB dividing B in training loops.
        x = jnp.pad(x, ((0, B_pad - B), (0, 0)))
        eps = jnp.pad(eps, ((0, B_pad - B), (0, 0)))

    grid = (B_pad // TB,)

    def batch_spec(cols):
        return pl.BlockSpec((TB, cols), lambda i: (i, 0))

    def resident_spec(a):
        # same block every grid step -> weight/bias stays in VMEM, DMA'd once
        return pl.BlockSpec(a.shape, lambda i: (0, 0))

    kernel = make_vae_kernel(xp, hp, zp)

    out = pl.pallas_call(
        kernel,
        out_shape=jax.ShapeDtypeStruct((B_pad, xp), jnp.float32),
        grid=grid,
        in_specs=[
            batch_spec(xp),                    # x
            batch_spec(zp),                    # eps
            resident_spec(packed["w_xh"]),
            resident_spec(packed["w_muvar"]),
            resident_spec(packed["w_zh"]),
            resident_spec(packed["w_hx"]),
            resident_spec(packed["b_packed"]),
        ],
        out_specs=batch_spec(xp),              # lane-dense 128-wide output slab
        compiler_params=pltpu.CompilerParams(
            dimension_semantics=("parallel",)),
    )(x, eps, packed["w_xh"], packed["w_muvar"], packed["w_zh"],
      packed["w_hx"], packed["b_packed"])

    return out[:B, :x_dim]


def init_params(key, x_dim, h_dim, z_dim):
    """PyTorch-like init: U(-1/sqrt(in), 1/sqrt(in)). Weights stored transposed
    to [in, out]; biases as [1, out] rows."""
    def linear(k, d_in, d_out):
        kw, kb = jax.random.split(k)
        bound = 1.0 / jnp.sqrt(d_in)
        w = jax.random.uniform(kw, (d_in, d_out), jnp.float32, -bound, bound)
        b = jax.random.uniform(kb, (1, d_out), jnp.float32, -bound, bound)
        return w, b

    keys = jax.random.split(key, 5)
    w_xh, b_xh = linear(keys[0], x_dim, h_dim)
    w_mu, b_mu = linear(keys[1], h_dim, z_dim)
    w_var, b_var = linear(keys[2], h_dim, z_dim)
    w_zh, b_zh = linear(keys[3], z_dim, h_dim)
    w_hx, b_hx = linear(keys[4], h_dim, x_dim)
    return dict(w_xh=w_xh, b_xh=b_xh, w_mu=w_mu, b_mu=b_mu,
                w_var=w_var, b_var=b_var, w_zh=w_zh, b_zh=b_zh,
                w_hx=w_hx, b_hx=b_hx)


def reference_forward(x, eps, p):
    h = x @ p["w_xh"] + p["b_xh"]
    z_mu = h @ p["w_mu"] + p["b_mu"]
    z_var = jax.nn.sigmoid(h @ p["w_var"] + p["b_var"])
    z = z_mu + jnp.exp(z_var * 0.5) * eps
    h2 = jnp.maximum(z @ p["w_zh"] + p["b_zh"], 0.0)
    return jax.nn.sigmoid(h2 @ p["w_hx"] + p["b_hx"])


if __name__ == "__main__":
    # Small feature dims consistent with the module; batch 512 gives grid=(4,)
    # with the default TB=128 so the pipeline actually has >1 step.
    B, X_DIM, H_DIM, Z_DIM = 512, 64, 32, 16

    key = jax.random.PRNGKey(0)
    k_x, k_eps, k_params = jax.random.split(key, 3)

    # binarized-MNIST-style input (training loop thresholds at 0.5)
    x = (jax.random.uniform(k_x, (B, X_DIM)) > 0.5).astype(jnp.float32)
    eps = jax.random.normal(k_eps, (B, Z_DIM), jnp.float32)
    params = init_params(k_params, X_DIM, H_DIM, Z_DIM)
    packed = pack_params(params, X_DIM, H_DIM, Z_DIM)

    x_recon = bernoulli_vae_forward(x, eps, packed)
    x_recon = jax.block_until_ready(x_recon)

    ref = reference_forward(x, eps, params)
    assert x_recon.shape == (B, X_DIM)
    assert jnp.allclose(x_recon, ref, atol=1e-5, rtol=1e-5), \
        f"max abs err {jnp.max(jnp.abs(x_recon - ref))}"

    print("KERNEL_OK")
</pallas_src>

<mosaic_0001>
module attributes {stable_mosaic.version = 11 : i64} {
  func.func @kernel(%arg0: i32, %arg1: memref<128x128xf32, #tpu.memory_space<vmem>>, %arg2: memref<128x128xf32, #tpu.memory_space<vmem>>, %arg3: memref<128x128xf32, #tpu.memory_space<vmem>>, %arg4: memref<128x256xf32, #tpu.memory_space<vmem>>, %arg5: memref<128x128xf32, #tpu.memory_space<vmem>>, %arg6: memref<128x128xf32, #tpu.memory_space<vmem>>, %arg7: memref<8x128xf32, #tpu.memory_space<vmem>>, %arg8: memref<128x128xf32, #tpu.memory_space<vmem>>) attributes {dimension_semantics = [#tpu.dimension_semantics<parallel>], iteration_bounds = array<i64: 4>, scalar_prefetch = 0 : i64, scratch_operands = 0 : i64, tpu.core_type = #tpu.core_type<tc>, window_params = [{transform_indices = @transform_0, window_bounds = array<i64: 128, 128>}, {transform_indices = @transform_1, window_bounds = array<i64: 128, 128>}, {pipeline_mode = #tpu.pipeline_mode<synchronous>, transform_indices = @transform_2, window_bounds = array<i64: 128, 128>}, {pipeline_mode = #tpu.pipeline_mode<synchronous>, transform_indices = @transform_3, window_bounds = array<i64: 128, 256>}, {pipeline_mode = #tpu.pipeline_mode<synchronous>, transform_indices = @transform_4, window_bounds = array<i64: 128, 128>}, {pipeline_mode = #tpu.pipeline_mode<synchronous>, transform_indices = @transform_5, window_bounds = array<i64: 128, 128>}, {pipeline_mode = #tpu.pipeline_mode<synchronous>, transform_indices = @transform_6, window_bounds = array<i64: 8, 128>}, {transform_indices = @transform_7, window_bounds = array<i64: 128, 128>}]} {
    %c0 = arith.constant 0 : index
    %c0_0 = arith.constant 0 : index
    %0 = vector.load %arg1[%c0, %c0_0] : memref<128x128xf32, #tpu.memory_space<vmem>>, vector<128x128xf32>
    %c0_1 = arith.constant 0 : index
    %c0_2 = arith.constant 0 : index
    %1 = vector.load %arg2[%c0_1, %c0_2] : memref<128x128xf32, #tpu.memory_space<vmem>>, vector<128x128xf32>
    %c0_3 = arith.constant 0 : index
    %c0_4 = arith.constant 0 : index
    %2 = vector.load %arg7[%c0_3, %c0_4] : memref<8x128xf32, #tpu.memory_space<vmem>>, vector<8x128xf32>
    %c0_5 = arith.constant 0 : index
    %c0_6 = arith.constant 0 : index
    %3 = vector.load %arg3[%c0_5, %c0_6] : memref<128x128xf32, #tpu.memory_space<vmem>>, vector<128x128xf32>
    %cst = arith.constant dense<0.000000e+00> : vector<128x128xf32>
    %4 = tpu.matmul %0, %3, %cst {dimension_numbers = #tpu.dot_dimension_numbers<[1], [0], [0], [1], [0, 0, 1, 1], [], []>} : vector<128x128xf32>, vector<128x128xf32>, vector<128x128xf32> -> vector<128x128xf32>
    %5 = vector.extract_strided_slice %2 {offsets = [0, 0], sizes = [1, 128], strides = [1, 1]} : vector<8x128xf32> to vector<1x128xf32>
    %6 = vector.broadcast %5 : vector<1x128xf32> to vector<128x128xf32>
    %7 = arith.addf %4, %6 : vector<128x128xf32>
    %c0_7 = arith.constant 0 : index
    %c0_8 = arith.constant 0 : index
    %8 = vector.load %arg4[%c0_7, %c0_8] : memref<128x256xf32, #tpu.memory_space<vmem>>, vector<128x256xf32>
    %cst_9 = arith.constant dense<0.000000e+00> : vector<128x256xf32>
    %9 = tpu.matmul %7, %8, %cst_9 {dimension_numbers = #tpu.dot_dimension_numbers<[1], [0], [0], [1], [0, 0, 1, 1], [], []>} : vector<128x128xf32>, vector<128x256xf32>, vector<128x256xf32> -> vector<128x256xf32>
    %10 = vector.extract_strided_slice %9 {offsets = [0, 0], sizes = [128, 128], strides = [1, 1]} : vector<128x256xf32> to vector<128x128xf32>
    %11 = vector.extract_strided_slice %2 {offsets = [1, 0], sizes = [1, 128], strides = [1, 1]} : vector<8x128xf32> to vector<1x128xf32>
    %12 = vector.broadcast %11 : vector<1x128xf32> to vector<128x128xf32>
    %13 = arith.addf %10, %12 : vector<128x128xf32>
    %14 = vector.extract_strided_slice %9 {offsets = [0, 128], sizes = [128, 128], strides = [1, 1]} : vector<128x256xf32> to vector<128x128xf32>
    %15 = vector.extract_strided_slice %2 {offsets = [2, 0], sizes = [1, 128], strides = [1, 1]} : vector<8x128xf32> to vector<1x128xf32>
    %16 = vector.broadcast %15 : vector<1x128xf32> to vector<128x128xf32>
    %17 = arith.addf %14, %16 : vector<128x128xf32>
    %18 = arith.negf %17 : vector<128x128xf32>
    %19 = math.exp %18 : vector<128x128xf32>
    %cst_10 = arith.constant 1.000000e+00 : f32
    %20 = vector.broadcast %cst_10 : f32 to vector<128x128xf32>
    %21 = arith.addf %20, %19 : vector<128x128xf32>
    %22 = arith.divf %20, %21 : vector<128x128xf32>
    %cst_11 = arith.constant 5.000000e-01 : f32
    %23 = vector.broadcast %cst_11 : f32 to vector<128x128xf32>
    %24 = arith.mulf %22, %23 : vector<128x128xf32>
    %25 = math.exp %24 : vector<128x128xf32>
    %26 = arith.mulf %25, %1 : vector<128x128xf32>
    %27 = arith.addf %13, %26 : vector<128x128xf32>
    %c0_12 = arith.constant 0 : index
    %c0_13 = arith.constant 0 : index
    %28 = vector.load %arg5[%c0_12, %c0_13] : memref<128x128xf32, #tpu.memory_space<vmem>>, vector<128x128xf32>
    %cst_14 = arith.constant dense<0.000000e+00> : vector<128x128xf32>
    %29 = tpu.matmul %27, %28, %cst_14 {dimension_numbers = #tpu.dot_dimension_numbers<[1], [0], [0], [1], [0, 0, 1, 1], [], []>} : vector<128x128xf32>, vector<128x128xf32>, vector<128x128xf32> -> vector<128x128xf32>
    %30 = vector.extract_strided_slice %2 {offsets = [3, 0], sizes = [1, 128], strides = [1, 1]} : vector<8x128xf32> to vector<1x128xf32>
    %31 = vector.broadcast %30 : vector<1x128xf32> to vector<128x128xf32>
    %32 = arith.addf %29, %31 : vector<128x128xf32>
    %cst_15 = arith.constant 0.000000e+00 : f32
    %33 = vector.broadcast %cst_15 : f32 to vector<128x128xf32>
    %34 = arith.maximumf %32, %33 : vector<128x128xf32>
    %c0_16 = arith.constant 0 : index
    %c0_17 = arith.constant 0 : index
    %35 = vector.load %arg6[%c0_16, %c0_17] : memref<128x128xf32, #tpu.memory_space<vmem>>, vector<128x128xf32>
    %cst_18 = arith.constant dense<0.000000e+00> : vector<128x128xf32>
    %36 = tpu.matmul %34, %35, %cst_18 {dimension_numbers = #tpu.dot_dimension_numbers<[1], [0], [0], [1], [0, 0, 1, 1], [], []>} : vector<128x128xf32>, vector<128x128xf32>, vector<128x128xf32> -> vector<128x128xf32>
    %37 = vector.extract_strided_slice %2 {offsets = [4, 0], sizes = [1, 128], strides = [1, 1]} : vector<8x128xf32> to vector<1x128xf32>
    %38 = vector.broadcast %37 : vector<1x128xf32> to vector<128x128xf32>
    %39 = arith.addf %36, %38 : vector<128x128xf32>
    %40 = arith.negf %39 : vector<128x128xf32>
    %41 = math.exp %40 : vector<128x128xf32>
    %cst_19 = arith.constant 1.000000e+00 : f32
    %42 = vector.broadcast %cst_19 : f32 to vector<128x128xf32>
    %43 = arith.addf %42, %41 : vector<128x128xf32>
    %44 = arith.divf %42, %43 : vector<128x128xf32>
    %c0_20 = arith.constant 0 : index
    %c0_21 = arith.constant 0 : index
    %45 = vector.load %arg8[%c0_20, %c0_21] : memref<128x128xf32, #tpu.memory_space<vmem>>, vector<128x128xf32>
    tpu.vector_store %arg8[%c0_20, %c0_21], %44 {strides = array<i32>} : memref<128x128xf32, #tpu.memory_space<vmem>>, vector<128x128xf32>,
    return
  }
  func.func @transform_0(%arg0: i32) -> (i32, i32) {
    %c0_i32 = arith.constant 0 : i32
    %c0_i32_0 = arith.constant 0 : i32
    return %arg0, %c0_i32 : i32, i32
  }
  func.func @transform_1(%arg0: i32) -> (i32, i32) {
    %c0_i32 = arith.constant 0 : i32
    %c0_i32_0 = arith.constant 0 : i32
    return %arg0, %c0_i32 : i32, i32
  }
  func.func @transform_2(%arg0: i32) -> (i32, i32) {
    %c0_i32 = arith.constant 0 : i32
    %c0_i32_0 = arith.constant 0 : i32
    %c0_i32_1 = arith.constant 0 : i32
    return %c0_i32, %c0_i32_0 : i32, i32
  }
  func.func @transform_3(%arg0: i32) -> (i32, i32) {
    %c0_i32 = arith.constant 0 : i32
    %c0_i32_0 = arith.constant 0 : i32
    %c0_i32_1 = arith.constant 0 : i32
    return %c0_i32, %c0_i32_0 : i32, i32
  }
  func.func @transform_4(%arg0: i32) -> (i32, i32) {
    %c0_i32 = arith.constant 0 : i32
    %c0_i32_0 = arith.constant 0 : i32
    %c0_i32_1 = arith.constant 0 : i32
    return %c0_i32, %c0_i32_0 : i32, i32
  }
  func.func @transform_5(%arg0: i32) -> (i32, i32) {
    %c0_i32 = arith.constant 0 : i32
    %c0_i32_0 = arith.constant 0 : i32
    %c0_i32_1 = arith.constant 0 : i32
    return %c0_i32, %c0_i32_0 : i32, i32
  }
  func.func @transform_6(%arg0: i32) -> (i32, i32) {
    %c0_i32 = arith.constant 0 : i32
    %c0_i32_0 = arith.constant 0 : i32
    %c0_i32_1 = arith.constant 0 : i32
    return %c0_i32, %c0_i32_0 : i32, i32
  }
  func.func @transform_7(%arg0: i32) -> (i32, i32) {
    %c0_i32 = arith.constant 0 : i32
    %c0_i32_0 = arith.constant 0 : i32
    return %arg0, %c0_i32 : i32, i32
  }
}

</mosaic_0001>

<bundles_post_ra>
// kernel: tpu_custom_call.1
= control target key start
LH: loop header
LB: loop body
LE: loop exit
PB: predicated region body
PF: predicated region fallthrough
CT: control target
= control target key end

     0   :  { %s3222_s0 = inlined_call_operand.hbm [shape: f32[512,128], index: 0, kind: input, shape index: {}]   ;;  %s3223_s1 = inlined_call_operand.hbm [shape: f32[512,128], index: 1, kind: input, shape index: {}]   ;;  %s3224_s2 = inlined_call_operand.hbm [shape: f32[128,128], index: 2, kind: input, shape index: {}]   ;;  %s3225_s3 = inlined_call_operand.hbm [shape: f32[128,256], index: 3, kind: input, shape index: {}]   ;;  %s3226_s4 = inlined_call_operand.hbm [shape: f32[128,128], index: 4, kind: input, shape index: {}]   ;;  %s3227_s5 = inlined_call_operand.hbm [shape: f32[128,128], index: 5, kind: input, shape index: {}]   ;;  %s3228_s6 = inlined_call_operand.vmem [shape: f32[8,128], index: 6, kind: input, shape index: {}]   ;;  %s3229_s7 = inlined_call_operand.hbm [shape: f32[512,128], index: 7, kind: output, shape index: {}]  }
   0x1   :  { %3237 = sst [smem:[#allocation21_spill]] %s3224_s2 }
   0x2   :  { %3238 = sst [smem:[#allocation22_spill]] %s3225_s3 }
   0x3   :  { %3239 = sst [smem:[#allocation23_spill]] %s3226_s4 }
   0x4   :  { %3240 = sst [smem:[#allocation24_spill]] %s3227_s5 }
   0x5   :  { %12 = vsyncpa [#allocation3], 0 }
   0x6   :  { %14 = vsyncpa [#allocation3 + $0x1], 0 }
   0x7   :  { %15 = vsyncpa [#allocation6], 0 }
   0x8   :  { %17 = vsyncpa [#allocation6 + $0x1], 0 }
   0x9   :  { %18 = vsyncpa [#allocation9], 0 }
   0xa   :  { %19 = vsyncpa [#allocation12], 0 }
   0xb   :  { %20 = vsyncpa [#allocation4], 0 }
   0xc   :  { %22 = vsyncpa [#allocation4 + $0x1], 0  ;;  %s2650_s24 = smov 0   ;;  %s2652_s25 = smov 0  }
   0xd   :  { %s2654_s26 = smov 0   ;;  %s2656_s27 = smov 0  }
   0xe LB: > { %s2671_s28 = sadd.s32 4294967295, %s2594_s27   ;;  %s1611_s29 = sadd.s32 4294967294, %s2594_s27   ;;  %s2594_s27 = sphi %s2656_s27, %s3269_s27   ;;  %s2590_s26 = sphi %s2654_s26, %s3268_s26   ;;  %s2586_s25 = sphi %s2652_s25, %s3267_s25   ;;  %s2582_s24 = sphi %s2650_s24, %s3266_s24  }
   0xf   : > { %p48_p0 = scmp.ne.s32.totalorder %s2586_s25, %s2582_s24  ;;  %p3230_p1 = scmp.eq.s32.totalorder %s2671_s28, 0 }
  0x10   : > { %p209_p3 = scmp.eq.s32.totalorder %s1611_s29, 3  ;;  %p1612_p5 = scmp.ge.s32.totalorder %s2594_s27, 1 }
  0x11   : > { %p2680_p4 = por %p3230_p1, %p48_p0  ;;  %p216_p7 = scmp.lt.s32.totalorder %s2594_s27, 5 }
  0x12   : > { %p2685_p6 = por %p209_p3, %p48_p0  ;;  %s2596_s10 = smov [#allocation7]  }
  0x13   : > { %s3241_s30 = scalar_select %p2680_p4, 1, 0 }
  0x14   : > { %s3242_s8 = scalar_select %p2685_p6, 1, 0 }
  0x15   : > { %p2690_p8 = pnand %p1612_p5, %p216_p7  ;;  %s228_s11 = sshll.u32 %s2596_s10, 4  ;;  %s229_s11 = int_to_ptr.vmem [resolvable:$true] %s228_s11 }
  0x16   : > { %s2597_s13 = smov [#allocation8]   ;;  %s3245_s2 = sld [smem:[#allocation21_spill]] }
  0x17   : > { %s3243_s9 = scalar_select %p2690_p8, 1, 0 }
  0x18   : > { %p2102_p9 = pneg %p2690_p8  ;;  %s241_s14 = sshll.u32 %s2597_s13, 4  ;;  %s2702_s14 = int_to_ptr.vmem [resolvable:$true] %s241_s14 }
  0x1a   : > { %p2698_p10 = pnand %p2102_p9, %p3230_p1 }
  0x1c   : > { %s2340_s17 = scalar_lea.hbm %s3245_s2, 2048  ;;  %p2712_p12 = pneg %p2698_p10 }
  0x1d   : > { %p2341_p11 = scmp.ne.s32.totalorder %s3245_s2, %s2340_s17  ;;  %p2347_p3 = scmp.lt.u32.totalorder %s2340_s17, %s3245_s2 }
  0x1f   : > { %p2343_p13 = pnand %p2712_p12, %p2341_p11 }
  0x21   : > { %p2344_p0 = pneg %p2343_p13 }
  0x23   : > { %p2349_p5 = pnand %p2347_p3, %p2344_p0 }
  0x25   : > { %2352 = shalt.err (!%p2349_p5)
}
  0x26   : > { %s2353_s23 = scalar_lea.vmem %s229_s11, 2048  ;;  %p2361_p2 = scmp.lt.s32.totalorder %s229_s11, %s229_s11 }
  0x27   : > { %p2354_p7 = scmp.ne.s32.totalorder %s229_s11, %s2353_s23  ;;  %p2362_p6 = scmp.lt.s32.totalorder %s2353_s23, %s2353_s23 }
  0x29   : > { %p2356_p9 = pnand %p2354_p7, %p2712_p12  ;;  %p2363_p4 = por %p2362_p6, %p2361_p2 }
  0x2b   : > { %p2357_p1 = pneg %p2356_p9 }
  0x2d   : > { %p2364_p8 = pnand %p2363_p4, %p2357_p1 }
  0x2f   : > { %2367 = shalt.err (!%p2364_p8)
}
  0x30   : > { %s3233_s29 = smov 128   ;;  %s3235_s10 = smov 8  }
  0x31   : > { %2105 = dma.hbm_to_vmem [thread:$0]  (!%p2698_p10), %s3245_s2, 2048, %s229_s11, [#allocation6], %s3233_s29, %s3233_s29, %s3235_s10  }
  0x32   : > { %s3247_s3 = sld [smem:[#allocation22_spill]] }
  0x38   : > { %s2368_s18 = scalar_lea.hbm %s3247_s3, 4096 }
  0x39   : > { %p2369_p1 = scmp.ne.s32.totalorder %s3247_s3, %s2368_s18  ;;  %p2375_p6 = scmp.lt.u32.totalorder %s2368_s18, %s3247_s3 }
  0x3b   : > { %p2371_p2 = pnand %p2369_p1, %p2712_p12 }
  0x3d   : > { %p2372_p4 = pneg %p2371_p2 }
  0x3f   : > { %p2377_p8 = pnand %p2375_p6, %p2372_p4 }
  0x41   : > { %2380 = shalt.err (!%p2377_p8)
}
  0x42   : > { %s2381_s11 = scalar_lea.vmem %s2702_s14, 4096  ;;  %p2389_p3 = scmp.lt.s32.totalorder %s2702_s14, %s2702_s14 }
  0x43   : > { %p2382_p11 = scmp.ne.s32.totalorder %s2702_s14, %s2381_s11  ;;  %p2390_p5 = scmp.lt.s32.totalorder %s2381_s11, %s2381_s11 }
  0x45   : > { %p2384_p13 = pnand %p2382_p11, %p2712_p12  ;;  %p2391_p7 = por %p2390_p5, %p2389_p3 }
  0x47   : > { %p2385_p0 = pneg %p2384_p13 }
  0x49   : > { %p2392_p9 = pnand %p2391_p7, %p2385_p0 }
  0x4b   : > { %2395 = shalt.err (!%p2392_p9)
}
  0x4c   : > { %s2600_s13 = smov 256   ;;  %s2601_s15 = smov 16  }
  0x4d   : > { %2108 = dma.hbm_to_vmem [thread:$0]  (!%p2698_p10), %s3247_s3, 4096, %s2702_s14, [#allocation9], %s2600_s13, %s2600_s13, %s2601_s15  }
  0x4e   : > { %s2602_s18 = smov [#allocation10]   ;;  %s2603_s21 = smov [#allocation11]  }
  0x4f   : > { %s254_s19 = sshll.u32 %s2602_s18, 4  ;;  %s267_s22 = sshll.u32 %s2603_s21, 4  ;;  %s255_s19 = int_to_ptr.vmem [resolvable:$true] %s254_s19  ;;  %s2754_s22 = int_to_ptr.vmem [resolvable:$true] %s267_s22 }
  0x50   : > { %s3248_s4 = sld [smem:[#allocation23_spill]] }
  0x56   : > { %s2396_s29 = scalar_lea.hbm %s3248_s4, 2048 }
  0x57   : > { %p2397_p1 = scmp.ne.s32.totalorder %s3248_s4, %s2396_s29  ;;  %p2403_p6 = scmp.lt.u32.totalorder %s2396_s29, %s3248_s4 }
  0x59   : > { %p2399_p2 = pnand %p2397_p1, %p2712_p12 }
  0x5b   : > { %p2400_p4 = pneg %p2399_p2 }
  0x5d   : > { %p2405_p8 = pnand %p2403_p6, %p2400_p4 }
  0x5f   : > { %2408 = shalt.err (!%p2405_p8)
}
  0x60   : > { %s2409_s13 = scalar_lea.vmem %s255_s19, 2048  ;;  %p2417_p3 = scmp.lt.s32.totalorder %s255_s19, %s255_s19 }
  0x61   : > { %p2410_p11 = scmp.ne.s32.totalorder %s255_s19, %s2409_s13  ;;  %p2418_p5 = scmp.lt.s32.totalorder %s2409_s13, %s2409_s13 }
  0x63   : > { %p2412_p13 = pnand %p2410_p11, %p2712_p12  ;;  %p2419_p7 = por %p2418_p5, %p2417_p3 }
  0x65   : > { %p2413_p0 = pneg %p2412_p13 }
  0x67   : > { %p2420_p9 = pnand %p2419_p7, %p2413_p0 }
  0x69   : > { %2423 = shalt.err (!%p2420_p9)
}
  0x6a   : > { %s3249_s2 = smov 8   ;;  %s3250_s10 = smov 128  }
  0x6b   : > { %2111 = dma.hbm_to_vmem [thread:$0]  (!%p2698_p10), %s3248_s4, 2048, %s255_s19, [#allocation9], %s3250_s10, %s3250_s10, %s3249_s2  }
  0x6c   : > { %s3251_s5 = sld [smem:[#allocation24_spill]] }
  0x72   : > { %s2424_s21 = scalar_lea.hbm %s3251_s5, 2048 }
  0x73   : > { %p2425_p1 = scmp.ne.s32.totalorder %s3251_s5, %s2424_s21  ;;  %p2431_p6 = scmp.lt.u32.totalorder %s2424_s21, %s3251_s5 }
  0x75   : > { %p2427_p2 = pnand %p2425_p1, %p2712_p12 }
  0x77   : > { %p2428_p4 = pneg %p2427_p2 }
  0x79   : > { %p2433_p8 = pnand %p2431_p6, %p2428_p4 }
  0x7b   : > { %2436 = shalt.err (!%p2433_p8)
}
  0x7c   : > { %s2437_s19 = scalar_lea.vmem %s2754_s22, 2048  ;;  %p2445_p3 = scmp.lt.s32.totalorder %s2754_s22, %s2754_s22 }
  0x7d   : > { %p2438_p11 = scmp.ne.s32.totalorder %s2754_s22, %s2437_s19  ;;  %p2446_p5 = scmp.lt.s32.totalorder %s2437_s19, %s2437_s19 }
  0x7f   : > { %p2440_p13 = pnand %p2438_p11, %p2712_p12  ;;  %p2447_p7 = por %p2446_p5, %p2445_p3 }
  0x81   : > { %p2441_p0 = pneg %p2440_p13 }
  0x83   : > { %p2448_p9 = pnand %p2447_p7, %p2441_p0 }
  0x85   : > { %2451 = shalt.err (!%p2448_p9)
}
  0x86   : > { %2114 = dma.hbm_to_vmem [thread:$0]  (!%p2698_p10), %s3251_s5, 2048, %s2754_s22, [#allocation12], %s3250_s10, %s3250_s10, %s3249_s2  }
  0x87   : > { %s2804_s12 = sadd.s32 1, %s2594_s27   ;;  %s35_s29 = sadd.s32 1, %s2590_s26 }
  0x88   : > { %s32_s20 = ssub.s32 %s2594_s27, %s2804_s12  ;;  %p42_p1 = scmp.ne.s32.totalorder %s2590_s26, %s2586_s25 }
  0x89   : > { %p33_p12 = scmp.eq.s32.totalorder %s32_s20, 0  ;;  %p43_p2 = scmp.eq.s32.totalorder %s2594_s27, 0 }
  0x8a   : > { %p3253_p6 = scmp.eq.s32.totalorder %s2671_s28, 3  ;;  %p2130_p11 = scmp.lt.s32.totalorder %s2594_s27, 4 }
  0x8b   : > { %s2813_s17 = scalar_select %p33_p12, %s2590_s26, %s35_s29  }
  0x8c   : > { %p44_p4 = por %p43_p2, %p42_p1  ;;  %p2817_p8 = por %p3253_p6, %p42_p1 }
  0x8d   : > { %3252 = sst [smem:[#allocation20_spill]] %s2813_s17  ;;  %s284_s21 = sand.u32 1, %s2590_s26  }
  0x8e   : > { %s1618_s23 = sshll.u32 %s284_s21, 7  ;;  %s1669_s22 = sshll.u32 %s2594_s27, 11 }
  0x8f   : > { %s2827_s14 = scalar_lea.hbm %s3222_s0, %s1669_s22  ;;  %s288_s19 = scalar_lea.vmem [#allocation2], %s1618_s23 }
  0x90   : > { %s295_s13 = sshll.u32 %s288_s19, 4  ;;  %p2831_p10 = pnand %p2130_p11, %p44_p4  ;;  %s2829_s13 = int_to_ptr.vmem [resolvable:$true] %s295_s13 }
  0x91   : > { %s2838_s11 = scalar_lea.hbm %s3223_s1, %s1669_s22  ;;  %s309_s16 = scalar_lea.vmem [#allocation5], %s1618_s23 }
  0x92   : > { %s2840_s3 = sshll.u32 %s309_s16, 4  ;;  %s2842_s4 = scalar_lea.sflag [#allocation3], %s284_s21  ;;  %s2874_s3 = int_to_ptr.vmem [resolvable:$true] %s2840_s3 }
  0x93   : > { %s2452_s19 = scalar_lea.hbm %s2827_s14, 2048  ;;  %p2454_p0 = pneg %p2831_p10 }
  0x94   : > { %p2453_p13 = scmp.ne.s32.totalorder %s2827_s14, %s2452_s19  ;;  %s2457_s20 = scalar_lea.hbm %s3222_s0, 8192 }
  0x95   : > { %p2458_p7 = scmp.lt.u32.totalorder %s2827_s14, %s3222_s0  ;;  %p2459_p9 = scmp.lt.u32.totalorder %s2457_s20, %s2452_s19 }
  0x96   : > { %p2455_p3 = pnand %p2454_p0, %p2453_p13  ;;  %p2461_p1 = scmp.lt.u32.totalorder %s2452_s19, %s2827_s14 }
  0x97   : > { %p2460_p12 = por %p2459_p9, %p2458_p7 }
  0x98   : > { %p2456_p5 = pneg %p2455_p3 }
  0x99   : > { %p2462_p2 = por %p2461_p1, %p2460_p12 }
  0x9b   : > { %p2463_p4 = pnand %p2462_p2, %p2456_p5 }
  0x9d   : > { %2466 = shalt.err (!%p2463_p4)
}
  0x9e   : > { %s2467_s21 = scalar_lea.vmem %s2829_s13, 2048  ;;  %s2604_s5 = smov [#allocation2]  }
  0x9f   : > { %p2468_p6 = scmp.ne.s32.totalorder %s2829_s13, %s2467_s21  ;;  %s2472_s17 = sshll.u32 %s2604_s5, 4  ;;  %s2473_s17 = int_to_ptr.vmem [resolvable:$false] %s2472_s17 }
  0xa0   : > { %s2474_s23 = scalar_lea.vmem %s2473_s17, 4096  ;;  %p2475_p3 = scmp.lt.s32.totalorder %s2829_s13, %s2473_s17 }
  0xa1   : > { %p2470_p11 = pnand %p2468_p6, %p2454_p0  ;;  %p2476_p7 = scmp.lt.s32.totalorder %s2474_s23, %s2467_s21 }
  0xa3   : > { %p2471_p13 = pneg %p2470_p11  ;;  %p2477_p9 = por %p2476_p7, %p2475_p3 }
  0xa5   : > { %p2478_p12 = pnand %p2477_p9, %p2471_p13 }
  0xa7   : > { %2481 = shalt.err (!%p2478_p12)
}
  0xa8   : > { %2118 = dma.hbm_to_vmem [thread:$0]  (!%p2831_p10), %s2827_s14, 2048, %s2829_s13, %s2842_s4, %s3250_s10, %s3250_s10, %s3249_s2  }
  0xa9   : > { %s305_s16 = sand.u32 1, %s2594_s27   ;;  %s2482_s20 = scalar_lea.hbm %s2838_s11, 2048 }
  0xaa   : > { %s2877_s19 = scalar_lea.sflag [#allocation6], %s305_s16  ;;  %p2483_p5 = scmp.ne.s32.totalorder %s2838_s11, %s2482_s20 }
  0xab   : > { %s2487_s21 = scalar_lea.hbm %s3223_s1, 8192  ;;  %p2488_p4 = scmp.lt.u32.totalorder %s2838_s11, %s3223_s1 }
  0xac   : > { %p2485_p1 = pnand %p2483_p5, %p2454_p0  ;;  %p2489_p6 = scmp.lt.u32.totalorder %s2487_s21, %s2482_s20 }
  0xad   : > { %p2491_p13 = scmp.lt.u32.totalorder %s2482_s20, %s2838_s11 }
  0xae   : > { %p2486_p2 = pneg %p2485_p1  ;;  %p2490_p11 = por %p2489_p6, %p2488_p4 }
  0xb0   : > { %p2492_p3 = por %p2491_p13, %p2490_p11 }
  0xb2   : > { %p2493_p7 = pnand %p2492_p3, %p2486_p2 }
  0xb4   : > { %2496 = shalt.err (!%p2493_p7)
}
  0xb5   : > { %s2497_s4 = scalar_lea.vmem %s2874_s3, 2048  ;;  %s2605_s14 = smov [#allocation5]  }
  0xb6   : > { %p2498_p9 = scmp.ne.s32.totalorder %s2874_s3, %s2497_s4  ;;  %s2502_s13 = sshll.u32 %s2605_s14, 4  ;;  %s2503_s13 = int_to_ptr.vmem [resolvable:$false] %s2502_s13 }
  0xb7   : > { %s2504_s23 = scalar_lea.vmem %s2503_s13, 4096  ;;  %p2505_p1 = scmp.lt.s32.totalorder %s2874_s3, %s2503_s13 }
  0xb8   : > { %p2500_p12 = pnand %p2498_p9, %p2454_p0  ;;  %p2506_p4 = scmp.lt.s32.totalorder %s2504_s23, %s2497_s4 }
  0xba   : > { %p2501_p5 = pneg %p2500_p12  ;;  %p2507_p6 = por %p2506_p4, %p2505_p1 }
  0xbc   : > { %p2508_p11 = pnand %p2507_p6, %p2501_p5 }
  0xbe   : > { %2511 = shalt.err (!%p2508_p11)
}
  0xbf   : > { %2121 = dma.hbm_to_vmem [thread:$0]  (!%p2831_p10), %s2838_s11, 2048, %s2874_s3, %s2877_s19, %s3250_s10, %s3250_s10, %s3249_s2  }
  0xc0   : > { %p3256_p0 = scmp.ne.s32.totalorder %s3243_s9, 0 }
  0xc1   : > { %s2909_s16 = sand.u32 (!%p3256_p0), 1, %s2586_s25   ;;  %p3257_p2 = scmp.ne.s32.totalorder (!%p3256_p0), %s3241_s30, 0 }
  0xc2   : > { %328 = sbr.rel (%p3256_p0) target bundleno = 1259 (0x4eb), region = 48  ;;  %s2912_s20 = sshll.u32 (!%p3256_p0), %s2909_s16, 7 }
  0xc3   : > { %s331_s15 = scalar_lea.sflag (!%p3256_p0), [#allocation3], %s2909_s16  ;;  %s2916_s29 = scalar_lea.vmem (!%p3256_p0), [#allocation2], %s2912_s20 }
  0xc9   : > { %2557 = dma.done.wait (%p3257_p2), %s331_s15, 2048  }
  0xca   : > { %2559 = vsyncadd (%p3257_p2), %s331_s15, 4294965248  ;;  %s339_s3 = sand.u32 1, %s2671_s28   ;;  %s2924_s2 = scalar_lea.vmem [#allocation5], %s2912_s20 }
  0xcb   : > { %s340_s9 = scalar_lea.sflag [#allocation6], %s339_s3 }
  0xcc   : > { %2561 = dma.done.wait (%p3257_p2), %s340_s9, 2048  }
  0xcd   : > { %2563 = vsyncadd (%p3257_p2), %s340_s9, 4294965248  ;;  %p3258_p10 = scmp.eq.s32.totalorder %s2671_s28, 0 }
  0xcf   : > { %2565 = dma.done.wait (%p3258_p10), [#allocation6], 2048   ;;  %p3259_p13 = pmov %p3258_p10 }
  0xd0   : > { %p3260_p3 = pmov %p3258_p10 }
  0xd1   : > { %2567 = vsyncadd (%p3259_p13), [#allocation6], 4294965248 }
  0xd2   : > { %2569 = dma.done.wait (%p3260_p3), [#allocation9], 6144   ;;  %p3261_p7 = pmov %p3260_p3 }
  0xd3   : > { %p3262_p9 = pmov %p3260_p3 }
  0xd4   : > { %2571 = vsyncadd (%p3261_p7), [#allocation9], 4294961152 }
  0xd5   : > { %2573 = dma.done.wait (%p3262_p9), [#allocation12], 2048   ;;  %p3263_p12 = pmov %p3260_p3 }
  0xd6   : > { %v431_v0 = vld [vmem:[#allocation7] sm:$0xff]  ;;  %v432_v1 = vld [vmem:[#allocation7 + $0x8] sm:$0xff]  ;;  %v433_v2 = vld [vmem:[#allocation7 + $0x10] sm:$0xff]  ;;  %s3146_s22 = scalar_lea.vmem [#allocation13], %s2912_s20  ;;  %s1671_s21 = sshll.u32 %s2671_s28, 11 }
  0xd7   : > { %2575 = vsyncadd (%p3263_p12), [#allocation12], 4294965248  ;;  %v1936_v3 = vpack.c.bf16 %v432_v1, %v431_v0  ;;  %v434_v4 = vld [vmem:[#allocation7 + $0x18] sm:$0xff]  ;;  %v435_v6 = vld [vmem:[#allocation7 + $0x20] sm:$0xff]  ;;  %s1477_s5 = sshll.u32 %s3146_s22, 4  ;;  %s3175_s14 = scalar_lea.hbm %s3229_s7, %s1671_s21  ;;  %s3177_s5 = int_to_ptr.vmem [resolvable:$true] %s1477_s5 }
  0xd8   : > { %v1940_v5 = vpack.c.bf16 %v434_v4, %v433_v2  ;;  %v436_v7 = vld [vmem:[#allocation7 + $0x28] sm:$0xff]  ;;  %v398_v9 = vld [vmem:[%s2916_s29] sm:$0xff]  ;;  %v437_v10 = vld [vmem:[#allocation7 + $0x30] sm:$0xff]  ;;  %s1464_s13 = scalar_lea.sflag [#allocation4], %s2909_s16  ;;  %s2512_s23 = scalar_lea.vmem %s3177_s5, 2048 }
  0xd9   : > { %1937 = vmatprep.subr.bf16.mxu0 %v1936_v3  ;;  %v1944_v8 = vpack.c.bf16 %v436_v7, %v435_v6  ;;  %v438_v11 = vld [vmem:[#allocation7 + $0x38] sm:$0xff]  ;;  %1800 = vmatprep.mubr.f32.mxu0 %v398_v9  ;;  %v439_v13 = vld [vmem:[#allocation7 + $0x40] sm:$0xff]  ;;  %v440_v14 = vld [vmem:[#allocation7 + $0x48] sm:$0xff]  ;;  %p2513_p5 = scmp.ne.s32.totalorder %s3177_s5, %s2512_s23  ;;  %s2607_s28 = smov [#allocation13]  }
  0xda   : > { %1939 = vmatpush3.bf16.msra.mxu0 %v1936_v3  ;;  %v1948_v12 = vpack.c.bf16 %v438_v11, %v437_v10  ;;  %v597_v15 = vld [vmem:[#allocation8 + $0x8] sm:$0xff]  ;;  %v599_v16 = vld [vmem:[#allocation8 + $0x18] sm:$0xff]  ;;  %v596_v17 = vld [vmem:[#allocation8] sm:$0xff]  ;;  %v1952_v24 = vpack.c.bf16 %v440_v14, %v439_v13  ;;  %s2516_s20 = sshll.u32 %s2607_s28, 4  ;;  %s2517_s20 = int_to_ptr.vmem [resolvable:$false] %s2516_s20 }
  0xdb   : > { %1941 = vmatprep.subr.bf16.mxu0 %v1940_v5  ;;  %v598_v18 = vld [vmem:[#allocation8 + $0x10] sm:$0xff]  ;;  %v1968_v19 = vpack.c.bf16 %v599_v16, %v597_v15  ;;  %v601_v21 = vld [vmem:[#allocation8 + $0x28] sm:$0xff]  ;;  %v603_v22 = vld [vmem:[#allocation8 + $0x38] sm:$0xff]  ;;  %p2514_p1 = pnand %p2513_p5, %p2817_p8  ;;  %s2518_s15 = scalar_lea.vmem %s2517_s20, 4096 }
  0xdc   : > { %v1970_v20 = vpack.c.bf16 %v598_v18, %v596_v17  ;;  %v600_v23 = vld [vmem:[#allocation8 + $0x20] sm:$0xff]  ;;  %v1972_v25 = vpack.c.bf16 %v603_v22, %v601_v21  ;;  %v602_v26 = vld [vmem:[#allocation8 + $0x30] sm:$0xff]  ;;  %v605_v27 = vld [vmem:[#allocation8 + $0x48] sm:$0xff]  ;;  %p2519_p6 = scmp.lt.s32.totalorder %s3177_s5, %s2517_s20  ;;  %p2520_p11 = scmp.lt.s32.totalorder %s2518_s15, %s2512_s23 }
  0xdd   : > { %v607_v28 = vld [vmem:[#allocation8 + $0x58] sm:$0xff]  ;;  %v441_v29 = vld [vmem:[#allocation7 + $0x50] sm:$0xff]  ;;  %1969 = vmatprep.subr.bf16.mxu1 %v1968_v19  ;;  %v1974_v31 = vpack.c.bf16 %v602_v26, %v600_v23  ;;  %v604_v33 = vld [vmem:[#allocation8 + $0x40] sm:$0xff]  ;;  %p2515_p4 = pneg %p2514_p1 }
  0xde   : > { %1943 = vmatpush3.bf16.msra.mxu0 %v1940_v5  ;;  %v442_v30 = vld [vmem:[#allocation7 + $0x58] sm:$0xff]  ;;  %1971 = vmatpush1.bf16.msra.mxu1 %v1970_v20  ;;  %v1976_v32 = vpack.c.bf16 %v607_v28, %v605_v27  ;;  %v606_v34 = vld [vmem:[#allocation8 + $0x50] sm:$0xff]  ;;  %v609_v36 = vld [vmem:[#allocation8 + $0x68] sm:$0xff]  ;;  %p2521_p0 = por %p2520_p11, %p2519_p6 }
  0xdf   : > { %1945 = vmatprep.subr.bf16.mxu0 %v1944_v8  ;;  %1973 = vmatprep.subr.bf16.mxu1 %v1972_v25  ;;  %v1956_v35 = vpack.c.bf16 %v442_v30, %v441_v29  ;;  %v611_v37 = vld [vmem:[#allocation8 + $0x78] sm:$0xff]  ;;  %v443_v38 = vld [vmem:[#allocation7 + $0x60] sm:$0xff]  ;;  %v444_v39 = vld [vmem:[#allocation7 + $0x68] sm:$0xff]  ;;  %v1978_v40 = vpack.c.bf16 %v606_v34, %v604_v33  ;;  %v447_v25 = vlaneseq }
  0xe0   : > { %v1980_v41 = vpack.c.bf16 %v611_v37, %v609_v36  ;;  %v608_v42 = vld [vmem:[#allocation8 + $0x60] sm:$0xff]  ;;  %v610_v43 = vld [vmem:[#allocation8 + $0x70] sm:$0xff]  ;;  %v1960_v44 = vpack.c.bf16 %v444_v39, %v443_v38  ;;  %v613_v45 = vld [vmem:[#allocation8 + $0x88] sm:$0xff]  ;;  %p2522_p2 = pnand %p2521_p0, %p2515_p4 }
  0xe1   : > { %v615_v46 = vld [vmem:[#allocation8 + $0x98] sm:$0xff]  ;;  %v445_v47 = vld [vmem:[#allocation7 + $0x70] sm:$0xff]  ;;  %v1982_v49 = vpack.c.bf16 %v610_v43, %v608_v42  ;;  %v612_v51 = vld [vmem:[#allocation8 + $0x80] sm:$0xff]  ;;  %v2959_v26 = vshrl.u32 %v447_v25, 7 }
  0xe2   : > { %1947 = vmatpush3.bf16.msra.mxu0 %v1944_v8  ;;  %1975 = vmatpush1.bf16.msra.mxu1 %v1974_v31  ;;  %v446_v48 = vld [vmem:[#allocation7 + $0x78] sm:$0xff]  ;;  %v1984_v50 = vpack.c.bf16 %v615_v46, %v613_v45  ;;  %v614_v52 = vld [vmem:[#allocation8 + $0x90] sm:$0xff]  ;;  %v617_v54 = vld [vmem:[#allocation8 + $0xa8] sm:$0xff] }
  0xe3   : > { %1949 = vmatprep.subr.bf16.mxu0 %v1948_v12  ;;  %1977 = vmatprep.subr.bf16.mxu1 %v1976_v32  ;;  %v1964_v53 = vpack.c.bf16 %v446_v48, %v445_v47  ;;  %v619_v55 = vld [vmem:[#allocation8 + $0xb8] sm:$0xff]  ;;  %v1986_v56 = vpack.c.bf16 %v614_v52, %v612_v51  ;;  %v616_v58 = vld [vmem:[#allocation8 + $0xa0] sm:$0xff]  ;;  %v618_v59 = vld [vmem:[#allocation8 + $0xb0] sm:$0xff]  ;;  %v449_v27 = vsub.s32 0, %v2959_v26 }
  0xe4   : > { %v1988_v57 = vpack.c.bf16 %v619_v55, %v617_v54  ;;  %v621_v60 = vld [vmem:[#allocation8 + $0xc8] sm:$0xff]  ;;  %v623_v61 = vld [vmem:[#allocation8 + $0xd8] sm:$0xff]  ;;  %v1990_v62 = vpack.c.bf16 %v618_v59, %v616_v58  ;;  %v620_v1 = vld [vmem:[#allocation8 + $0xc0] sm:$0xff] }
  0xe5   : > { %v399_v63 = vld [vmem:[%s2916_s29 + $0x8] sm:$0xff]  ;;  %v1992_v0 = vpack.c.bf16 %v623_v61, %v621_v60  ;;  %v622_v2 = vld [vmem:[#allocation8 + $0xd0] sm:$0xff]  ;;  %v401_v5 = vld [vmem:[%s2916_s29 + $0x18] sm:$0xff] }
  0xe6   : > { %1951 = vmatpush3.bf16.msra.mxu0 %v1948_v12  ;;  %1979 = vmatpush1.bf16.msra.mxu1 %v1978_v40  ;;  %v400_v3 = vld [vmem:[%s2916_s29 + $0x10] sm:$0xff]  ;;  %v1994_v4 = vpack.c.bf16 %v622_v2, %v620_v1  ;;  %v402_v6 = vld [vmem:[%s2916_s29 + $0x20] sm:$0xff]  ;;  %v403_v7 = vld [vmem:[%s2916_s29 + $0x28] sm:$0xff] }
  0xe7   : > { %1953 = vmatprep.subr.bf16.mxu0 %v1952_v24  ;;  %1981 = vmatprep.subr.bf16.mxu1 %v1980_v41  ;;  %v404_v8 = vld [vmem:[%s2916_s29 + $0x30] sm:$0xff]  ;;  %v405_v9 = vld [vmem:[%s2916_s29 + $0x38] sm:$0xff]  ;;  %v406_v10 = vld [vmem:[%s2916_s29 + $0x40] sm:$0xff] }
  0xe8   : > { %v407_v11 = vld [vmem:[%s2916_s29 + $0x48] sm:$0xff]  ;;  %v408_v12 = vld [vmem:[%s2916_s29 + $0x50] sm:$0xff]  ;;  %v409_v13 = vld [vmem:[%s2916_s29 + $0x58] sm:$0xff] }
  0xe9   : > { %v410_v14 = vld [vmem:[%s2916_s29 + $0x60] sm:$0xff]  ;;  %v411_v15 = vld [vmem:[%s2916_s29 + $0x68] sm:$0xff]  ;;  %v412_v16 = vld [vmem:[%s2916_s29 + $0x70] sm:$0xff] }
  0xea   : > { %1955 = vmatpush3.bf16.msra.mxu0 %v1952_v24  ;;  %1983 = vmatpush1.bf16.msra.mxu1 %v1982_v49  ;;  %v413_v17 = vld [vmem:[%s2916_s29 + $0x78] sm:$0xff]  ;;  %v625_v18 = vld [vmem:[#allocation8 + $0xe8] sm:$0xff]  ;;  %v624_v21 = vld [vmem:[#allocation8 + $0xe0] sm:$0xff]  ;;  %v2606_v24 = vmov 0.0  }
  0xeb   : > { %1957 = vmatprep.subr.bf16.mxu0 %v1956_v35  ;;  %1985 = vmatprep.subr.bf16.mxu1 %v1984_v50  ;;  %v627_v19 = vld [vmem:[#allocation8 + $0xf8] sm:$0xff]  ;;  %v626_v22 = vld [vmem:[#allocation8 + $0xf0] sm:$0xff]  ;;  %v2965_v28 = vld [vmem:[%s3228_s6] sm:$0xff] }
  0xec   : > { %v1996_v20 = vpack.c.bf16 %v627_v19, %v625_v18  ;;  %v1998_v23 = vpack.c.bf16 %v626_v22, %v624_v21  ;;  %692 = vmatprep.mubr.f32.mxu1 %v2606_v24  ;;  %v450_v29 = vrot.slane %v2965_v28, %v449_v27  ;;  %v1007_v1 = vld [vmem:[#allocation10 + $0x10] sm:$0xff]  ;;  %v1008_v2 = vld [vmem:[#allocation10 + $0x18] sm:$0xff]  ;;  %v1186_v22 = vld [vmem:[#allocation11] sm:$0xff] }
  0xed   : > { %v1019_v19 = vld [vmem:[#allocation10 + $0x70] sm:$0xff]  ;;  %v1189_v27 = vld [vmem:[#allocation11 + $0x18] sm:$0xff] }
  0xee   : > { %1959 = vmatpush3.bf16.msra.mxu0 %v1956_v35  ;;  %1987 = vmatpush1.bf16.msra.mxu1 %v1986_v56 }
  0xef   : > { %1961 = vmatprep.subr.bf16.mxu0 %v1960_v44  ;;  %1989 = vmatprep.subr.bf16.mxu1 %v1988_v57 }
  0xf2   : > { %1963 = vmatpush3.bf16.msra.mxu0 %v1960_v44  ;;  %1991 = vmatpush1.bf16.msra.mxu1 %v1990_v62  ;;  %v1005_v62 = vld [vmem:[#allocation10] sm:$0xff] }
  0xf3   : > { %1965 = vmatprep.subr.bf16.mxu0 %v1964_v53  ;;  %1993 = vmatprep.subr.bf16.mxu1 %v1992_v0 }
  0xf6   : > { %1967 = vmatpush3.bf16.msra.mxu0 %v1964_v53  ;;  %1995 = vmatpush1.bf16.msra.mxu1 %v1994_v4  ;;  %v1009_v4 = vld [vmem:[#allocation10 + $0x20] sm:$0xff] }
  0xf7   : > { %1997 = vmatprep.subr.bf16.mxu1 %v1996_v20  ;;  %v1020_v20 = vld [vmem:[#allocation10 + $0x78] sm:$0xff] }
  0xf8   : > { %v2028_v21 = vpack.c.bf16 %v1020_v20, %v1019_v19 }
  0xf9   : > { %1801 = vmatmul.mubr.f32.vlgmr.msra.gmra.mrb[0].mxu0 %v399_v63  ;;  %v1006_v63 = vld [vmem:[#allocation10 + $0x8] sm:$0xff] }
  0xfa   : > { %1803 = vmatprep.mubr.f32.mxu0 %v400_v3  ;;  %1999 = vmatpush1.bf16.msra.mxu1 %v1998_v23  ;;  %v2000_v0 = vpack.c.bf16 %v1006_v63, %v1005_v62  ;;  %v2004_v3 = vpack.c.bf16 %v1008_v2, %v1007_v1  ;;  %v1187_v23 = vld [vmem:[#allocation11 + $0x8] sm:$0xff] }
  0xfb   : > { %v2983_v25 = vpack.c.bf16 %v1187_v23, %v1186_v22 }
  0xfc   : > { %2001 = vmatprep.subr.bf16.mxu0 %v2000_v0 }
  0xfd   : > { %1804 = vmatmul.mubr.f32.gmra.mrb[2].mxu0 %v401_v5  ;;  %v1010_v5 = vld [vmem:[#allocation10 + $0x28] sm:$0xff]  ;;  %2064 = vmatprep.subr.bf16.mxu1 %v2983_v25 }
  0xfe   : > { %1806 = vmatprep.mubr.f32.mxu0 %v402_v6  ;;  %2003 = vmatpush3.bf16.msra.mxu0 %v2000_v0  ;;  %v2008_v6 = vpack.c.bf16 %v1010_v5, %v1009_v4 }
  0xff   : > { %2005 = vmatprep.subr.bf16.mxu0 %v2004_v3 }
 0x101   : > { %1807 = vmatmul.mubr.f32.gmra.mrb[4].mxu0 %v403_v7  ;;  %v1011_v7 = vld [vmem:[#allocation10 + $0x30] sm:$0xff] }
 0x102   : > { %1809 = vmatprep.mubr.f32.mxu0 %v404_v8  ;;  %2007 = vmatpush3.bf16.msra.mxu0 %v2004_v3  ;;  %v1012_v8 = vld [vmem:[#allocation10 + $0x38] sm:$0xff] }
 0x103   : > { %2009 = vmatprep.subr.bf16.mxu0 %v2008_v6 }
 0x105   : > { %1810 = vmatmul.mubr.f32.gmra.mrb[6].mxu0 %v405_v9  ;;  %v2012_v9 = vpack.c.bf16 %v1012_v8, %v1011_v7 }
 0x106   : > { %1812 = vmatprep.mubr.f32.mxu0 %v406_v10  ;;  %2011 = vmatpush3.bf16.msra.mxu0 %v2008_v6  ;;  %v1013_v10 = vld [vmem:[#allocation10 + $0x40] sm:$0xff] }
 0x107   : > { %2013 = vmatprep.subr.bf16.mxu0 %v2012_v9 }
 0x109   : > { %1813 = vmatmul.mubr.f32.gmra.mrb[8].mxu0 %v407_v11  ;;  %v1014_v11 = vld [vmem:[#allocation10 + $0x48] sm:$0xff] }
 0x10a   : > { %1815 = vmatprep.mubr.f32.mxu0 %v408_v12  ;;  %2015 = vmatpush3.bf16.msra.mxu0 %v2012_v9  ;;  %v2016_v12 = vpack.c.bf16 %v1014_v11, %v1013_v10 }
 0x10c   : > { %2017 = vmatprep.subr.bf16.mxu0 %v2016_v12 }
 0x10d   : > { %1816 = vmatmul.mubr.f32.gmra.mrb[10].mxu0 %v409_v13  ;;  %v1015_v13 = vld [vmem:[#allocation10 + $0x50] sm:$0xff] }
 0x10e   : > { %1818 = vmatprep.mubr.f32.mxu0 %v410_v14  ;;  %2019 = vmatpush3.bf16.msra.mxu0 %v2016_v12  ;;  %v1016_v14 = vld [vmem:[#allocation10 + $0x58] sm:$0xff] }
 0x111   : > { %1819 = vmatmul.mubr.f32.gmra.mrb[12].mxu0 %v411_v15  ;;  %v2020_v15 = vpack.c.bf16 %v1016_v14, %v1015_v13 }
 0x112   : > { %1821 = vmatprep.mubr.f32.mxu0 %v412_v16  ;;  %v1017_v16 = vld [vmem:[#allocation10 + $0x60] sm:$0xff] }
 0x113   : > { %2021 = vmatprep.subr.bf16.mxu0 %v2020_v15 }
 0x114   : > { %2023 = vmatpush3.bf16.msra.mxu0 %v2020_v15 }
 0x115   : > { %1822 = vmatmul.mubr.f32.gmra.mrb[14].mxu0 %v413_v17  ;;  %v1018_v17 = vld [vmem:[#allocation10 + $0x68] sm:$0xff] }
 0x116   : > { %v2024_v18 = vpack.c.bf16 %v1018_v17, %v1017_v16 }
 0x118   : > { %2025 = vmatprep.subr.bf16.mxu0 %v2024_v18 }
 0x119   : > { %2027 = vmatpush3.bf16.msra.mxu0 %v2024_v18 }
 0x11a   : > { %2029 = vmatprep.subr.bf16.mxu0 %v2028_v21 }
 0x11d   : > { %2031 = vmatpush3.bf16.msra.mxu0 %v2028_v21 }
 0x11e   : > { %2033 = vmatprep.subr.bf16.mxu0 %v2983_v25 }
 0x1cc   : > { %v1802_v30 = vpop.f32.mrb[0].mxu0 }
 0x1cd   : > { %v517_v31 = vpop.f32.mrb[1].mxu0  ;;  %v523_v35 = vadd.f32 %v1802_v30, %v450_v29  ;;  %v1190_v30 = vld [vmem:[#allocation11 + $0x20] sm:$0xff] }
 0x1ce   : > { %v518_v32 = vadd.f32 %v517_v31, %v450_v29  ;;  %v1191_v31 = vld [vmem:[#allocation11 + $0x28] sm:$0xff] }
 0x1d0   : > { %693 = vmatmul.mubr.f32.vlgmr.msra.gmra.mrb[0].mxu1 %v518_v32  ;;  %v1805_v33 = vpop.f32.mrb[2].mxu0  ;;  %v2991_v32 = vpack.c.bf16 %v1191_v31, %v1190_v30 }
 0x1d1   : > { %698 = vmatprep.mubr.f32.mxu1 %v2606_v24  ;;  %v527_v34 = vpop.f32.mrb[3].mxu0  ;;  %v533_v41 = vadd.f32 %v1805_v33, %v450_v29  ;;  %2072 = vmatpush3.bf16.msra.mxu1 %v2983_v25  ;;  %v1192_v33 = vld [vmem:[#allocation11 + $0x30] sm:$0xff] }
 0x1d2   : > { %v528_v36 = vadd.f32 %v527_v34, %v450_v29  ;;  %v1193_v34 = vld [vmem:[#allocation11 + $0x38] sm:$0xff] }
 0x1d4   : > { %699 = vmatmul.mubr.f32.gmra.mrb[2].mxu1 %v523_v35  ;;  %v1808_v37 = vpop.f32.mrb[4].mxu0  ;;  %v2995_v35 = vpack.c.bf16 %v1193_v34, %v1192_v33 }
 0x1d5   : > { %704 = vmatprep.mubr.f32.mxu1 %v2606_v24  ;;  %v537_v38 = vpop.f32.mrb[5].mxu0  ;;  %v543_v47 = vadd.f32 %v1808_v37, %v450_v29  ;;  %v1195_v37 = vld [vmem:[#allocation11 + $0x48] sm:$0xff] }
 0x1d6   : > { %v538_v42 = vadd.f32 %v537_v38, %v450_v29  ;;  %v811_v38 = vsub.s32 2, %v2959_v26 }
 0x1d8   : > { %705 = vmatmul.mubr.f32.gmra.mrb[4].mxu1 %v528_v36  ;;  %v1811_v39 = vpop.f32.mrb[6].mxu0  ;;  %v1194_v36 = vld [vmem:[#allocation11 + $0x40] sm:$0xff] }
 0x1d9   : > { %710 = vmatprep.mubr.f32.mxu1 %v2606_v24  ;;  %v547_v40 = vpop.f32.mrb[7].mxu0  ;;  %v553_v53 = vadd.f32 %v1811_v39, %v450_v29  ;;  %v3000_v39 = vpack.c.bf16 %v1195_v37, %v1194_v36 }
 0x1da   : > { %v548_v48 = vadd.f32 %v547_v40, %v450_v29  ;;  %v1196_v40 = vld [vmem:[#allocation11 + $0x50] sm:$0xff] }
 0x1dc   : > { %711 = vmatmul.mubr.f32.gmra.mrb[6].mxu1 %v533_v41  ;;  %v1814_v43 = vpop.f32.mrb[8].mxu0  ;;  %v1197_v41 = vld [vmem:[#allocation11 + $0x58] sm:$0xff] }
 0x1dd   : > { %716 = vmatprep.mubr.f32.mxu1 %v2606_v24  ;;  %v557_v44 = vpop.f32.mrb[9].mxu0  ;;  %v563_v55 = vadd.f32 %v1814_v43, %v450_v29 }
 0x1de   : > { %v558_v54 = vadd.f32 %v557_v44, %v450_v29  ;;  %v3009_v44 = vpack.c.bf16 %v1197_v41, %v1196_v40 }
 0x1e0   : > { %717 = vmatmul.mubr.f32.gmra.mrb[8].mxu1 %v538_v42  ;;  %v1817_v45 = vpop.f32.mrb[10].mxu0  ;;  %v3004_v42 = vrot.slane %v2965_v28, %v811_v38 }
 0x1e1   : > { %722 = vmatprep.mubr.f32.mxu1 %v2606_v24  ;;  %v567_v46 = vpop.f32.mrb[11].mxu0  ;;  %v573_v57 = vadd.f32 %v1817_v45, %v450_v29 }
 0x1e2   : > { %v568_v56 = vadd.f32 %v567_v46, %v450_v29  ;;  %v1198_v46 = vld [vmem:[#allocation11 + $0x60] sm:$0xff] }
 0x1e4   : > { %723 = vmatmul.mubr.f32.gmra.mrb[10].mxu1 %v543_v47  ;;  %v1820_v49 = vpop.f32.mrb[12].mxu0  ;;  %v1199_v47 = vld [vmem:[#allocation11 + $0x68] sm:$0xff] }
 0x1e5   : > { %728 = vmatprep.mubr.f32.mxu1 %v2606_v24  ;;  %v577_v50 = vpop.f32.mrb[13].mxu0  ;;  %v583_v59 = vadd.f32 %v1820_v49, %v450_v29 }
 0x1e6   : > { %v578_v58 = vadd.f32 %v577_v50, %v450_v29 }
 0x1e8   : > { %729 = vmatmul.mubr.f32.gmra.mrb[12].mxu1 %v548_v48  ;;  %v1823_v51 = vpop.f32.mrb[14].mxu0 }
 0x1e9   : > { %734 = vmatprep.mubr.f32.mxu1 %v2606_v24  ;;  %v587_v52 = vpop.f32.mrb[15].mxu0  ;;  %v593_v61 = vadd.f32 %v1823_v51, %v450_v29  ;;  %v3016_v51 = vpack.c.bf16 %v1199_v47, %v1198_v46 }
 0x1ea   : > { %v588_v60 = vadd.f32 %v587_v52, %v450_v29 }
 0x1ec   : > { %735 = vmatmul.mubr.f32.gmra.mrb[14].mxu1 %v553_v53 }
 0x1ed   : > { %740 = vmatprep.mubr.f32.mxu1 %v2606_v24 }
 0x1f0   : > { %741 = vmatmul.mubr.f32.gmra.mrb[16].mxu1 %v558_v54 }
 0x1f1   : > { %746 = vmatprep.mubr.f32.mxu1 %v2606_v24 }
 0x1f4   : > { %747 = vmatmul.mubr.f32.gmra.mrb[18].mxu1 %v563_v55 }
 0x1f5   : > { %752 = vmatprep.mubr.f32.mxu1 %v2606_v24 }
 0x1f8   : > { %753 = vmatmul.mubr.f32.gmra.mrb[20].mxu1 %v568_v56 }
 0x1f9   : > { %758 = vmatprep.mubr.f32.mxu1 %v2606_v24 }
 0x1fc   : > { %759 = vmatmul.mubr.f32.gmra.mrb[22].mxu1 %v573_v57 }
 0x1fd   : > { %764 = vmatprep.mubr.f32.mxu1 %v2606_v24 }
 0x200   : > { %765 = vmatmul.mubr.f32.gmra.mrb[24].mxu1 %v578_v58 }
 0x201   : > { %770 = vmatprep.mubr.f32.mxu1 %v2606_v24 }
 0x204   : > { %771 = vmatmul.mubr.f32.gmra.mrb[26].mxu1 %v583_v59 }
 0x205   : > { %776 = vmatprep.mubr.f32.mxu1 %v2606_v24 }
 0x208   : > { %777 = vmatmul.mubr.f32.gmra.mrb[28].mxu1 %v588_v60 }
 0x209   : > { %782 = vmatprep.mubr.f32.mxu1 %v2606_v24  ;;  %v1188_v24 = vld [vmem:[#allocation11 + $0x10] sm:$0xff] }
 0x20a   : > { %v2986_v29 = vpack.c.bf16 %v1189_v27, %v1188_v24 }
 0x20c   : > { %783 = vmatmul.mubr.f32.gmra.mrb[30].mxu1 %v593_v61  ;;  %2065 = vmatprep.subr.bf16.mxu1 %v2986_v29 }
 0x20d   : > { %2073 = vmatpush3.bf16.msra.mxu1 %v2986_v29 }
 0x20e   : > { %2066 = vmatprep.subr.bf16.mxu1 %v2991_v32 }
 0x211   : > { %2074 = vmatpush3.bf16.msra.mxu1 %v2991_v32 }
 0x212   : > { %2067 = vmatprep.subr.bf16.mxu1 %v2995_v35 }
 0x215   : > { %2075 = vmatpush3.bf16.msra.mxu1 %v2995_v35 }
 0x216   : > { %2068 = vmatprep.subr.bf16.mxu1 %v3000_v39 }
 0x219   : > { %2076 = vmatpush3.bf16.msra.mxu1 %v3000_v39 }
 0x21a   : > { %2069 = vmatprep.subr.bf16.mxu1 %v3009_v44 }
 0x21d   : > { %2077 = vmatpush3.bf16.msra.mxu1 %v3009_v44 }
 0x21e   : > { %2070 = vmatprep.subr.bf16.mxu1 %v3016_v51 }
 0x221   : > { %2078 = vmatpush3.bf16.msra.mxu1 %v3016_v51 }
 0x2a3   : > { %v3007_v43 = vpop.f32.mrb[0].mxu1 }
 0x2a4   : > { %v696_v45 = vpop.f32.mrb[1].mxu1 }
 0x2a5   : > { %v813_v48 = vadd.f32 %v3004_v42, %v696_v45 }
 0x2a7   : > { %v1632_v49 = vmul.f32 -1.442695, %v813_v48  ;;  %v3014_v50 = vpop.f32.mrb[2].mxu1  ;;  %v791_v48 = vsub.s32 1, %v2959_v26 }
 0x2a8   : > { %v702_v52 = vpop.f32.mrb[3].mxu1 }
 0x2a9   : > { %2179 = vpow2.f32 %v1632_v49  ;;  %v814_v53 = vadd.f32 %v3004_v42, %v702_v52 }
 0x2ab   : > { %v1633_v54 = vmul.f32 -1.442695, %v814_v53  ;;  %v3021_v55 = vpop.f32.mrb[4].mxu1 }
 0x2ac   : > { %v708_v56 = vpop.f32.mrb[5].mxu1 }
 0x2ad   : > { %2181 = vpow2.f32 %v1633_v54  ;;  %v815_v57 = vadd.f32 %v3004_v42, %v708_v56 }
 0x2af   : > { %v1634_v58 = vmul.f32 -1.442695, %v815_v57  ;;  %v3025_v59 = vpop.f32.mrb[6].mxu1 }
 0x2b0   : > { %v714_v60 = vpop.f32.mrb[7].mxu1 }
 0x2b1   : > { %2183 = vpow2.f32 %v1634_v58  ;;  %v816_v61 = vadd.f32 %v3004_v42, %v714_v60 }
 0x2b3   : > { %v2180_v62 = vpop.eup %2179  ;;  %v1635_v63 = vmul.f32 -1.442695, %v816_v61  ;;  %v3028_v0 = vpop.f32.mrb[8].mxu1 }
 0x2b4   : > { %v877_v1 = vadd.f32 1.0, %v2180_v62  ;;  %v720_v2 = vpop.f32.mrb[9].mxu1  ;;  %v3050_v62 = vrot.slane %v2965_v28, %v791_v48 }
 0x2b5   : > { %2185 = vpow2.f32 %v1635_v63  ;;  %v817_v3 = vadd.f32 %v3004_v42, %v720_v2 }
 0x2b6   : > { %2187 = vrcp.f32 %v877_v1 }
 0x2b7   : > { %v2182_v4 = vpop.eup %2181  ;;  %v1636_v5 = vmul.f32 -1.442695, %v817_v3  ;;  %v3031_v6 = vpop.f32.mrb[10].mxu1 }
 0x2b8   : > { %v878_v7 = vadd.f32 1.0, %v2182_v4  ;;  %v726_v8 = vpop.f32.mrb[11].mxu1  ;;  %v414_v4 = vld [vmem:[%s2924_s2] sm:$0xff] }
 0x2b9   : > { %2189 = vpow2.f32 %v1636_v5  ;;  %v818_v9 = vadd.f32 %v3004_v42, %v726_v8 }
 0x2ba   : > { %2191 = vrcp.f32 %v878_v7 }
 0x2bb   : > { %v2184_v10 = vpop.eup %2183  ;;  %v1637_v11 = vmul.f32 -1.442695, %v818_v9  ;;  %v3034_v12 = vpop.f32.mrb[12].mxu1 }
 0x2bc   : > { %v879_v13 = vadd.f32 1.0, %v2184_v10  ;;  %v732_v14 = vpop.f32.mrb[13].mxu1 }
 0x2bd   : > { %2193 = vpow2.f32 %v1637_v11  ;;  %v819_v15 = vadd.f32 %v3004_v42, %v732_v14  ;;  %v793_v11 = vadd.f32 %v3050_v62, %v3007_v43  ;;  %v794_v43 = vadd.f32 %v3050_v62, %v3014_v50 }
 0x2be   : > { %2195 = vrcp.f32 %v879_v13 }
 0x2bf   : > { %v2186_v16 = vpop.eup %2185  ;;  %v1638_v17 = vmul.f32 -1.442695, %v819_v15  ;;  %v3037_v18 = vpop.f32.mrb[14].mxu1 }
 0x2c0   : > { %v2188_v19 = vpop.eup %2187  ;;  %v880_v20 = vadd.f32 1.0, %v2186_v16  ;;  %v738_v21 = vpop.f32.mrb[15].mxu1 }
 0x2c1   : > { %v925_v22 = vmul.f32 0.5, %v2188_v19  ;;  %2197 = vpow2.f32 %v1638_v17  ;;  %v820_v23 = vadd.f32 %v3004_v42, %v738_v21  ;;  %v415_v19 = vld [vmem:[%s2924_s2 + $0x8] sm:$0xff] }
 0x2c2   : > { %2199 = vrcp.f32 %v880_v20 }
 0x2c3   : > { %v2190_v24 = vpop.eup %2189  ;;  %v941_v27 = vmul.f32 1.442695, %v925_v22  ;;  %v1639_v30 = vmul.f32 -1.442695, %v820_v23  ;;  %v3040_v31 = vpop.f32.mrb[16].mxu1 }
 0x2c4   : > { %v2192_v33 = vpop.eup %2191  ;;  %v881_v34 = vadd.f32 1.0, %v2190_v24  ;;  %v744_v36 = vpop.f32.mrb[17].mxu1 }
 0x2c5   : > { %2201 = vpow2.f32 %v941_v27  ;;  %v926_v37 = vmul.f32 0.5, %v2192_v33  ;;  %v821_v38 = vadd.f32 %v3004_v42, %v744_v36 }
 0x2c6   : > { %2203 = vrcp.f32 %v881_v34 }
 0x2c7   : > { %v2194_v40 = vpop.eup %2193  ;;  %v943_v41 = vmul.f32 1.442695, %v926_v37  ;;  %2205 = vpow2.f32 %v1639_v30  ;;  %v1640_v45 = vmul.f32 -1.442695, %v821_v38  ;;  %v3043_v46 = vpop.f32.mrb[18].mxu1 }
 0x2c8   : > { %v2196_v47 = vpop.eup %2195  ;;  %v882_v49 = vadd.f32 1.0, %v2194_v40  ;;  %v750_v52 = vpop.f32.mrb[19].mxu1  ;;  %v416_v40 = vld [vmem:[%s2924_s2 + $0x10] sm:$0xff] }
 0x2c9   : > { %2207 = vpow2.f32 %v943_v41  ;;  %v927_v53 = vmul.f32 0.5, %v2196_v47  ;;  %v822_v54 = vadd.f32 %v3004_v42, %v750_v52 }
 0x2ca   : > { %2209 = vrcp.f32 %v882_v49 }
 0x2cb   : > { %v2198_v56 = vpop.eup %2197  ;;  %v945_v57 = vmul.f32 1.442695, %v927_v53  ;;  %2211 = vpow2.f32 %v1640_v45  ;;  %v1641_v58 = vmul.f32 -1.442695, %v822_v54  ;;  %v3047_v60 = vpop.f32.mrb[20].mxu1  ;;  %v795_v53 = vadd.f32 %v3050_v62, %v3021_v55 }
 0x2cc   : > { %v2200_v61 = vpop.eup %2199  ;;  %v883_v63 = vadd.f32 1.0, %v2198_v56  ;;  %v756_v1 = vpop.f32.mrb[21].mxu1 }
 0x2cd   : > { %2213 = vpow2.f32 %v945_v57  ;;  %v928_v2 = vmul.f32 0.5, %v2200_v61  ;;  %v823_v3 = vadd.f32 %v3004_v42, %v756_v1 }
 0x2ce   : > { %2215 = vrcp.f32 %v883_v63  ;;  %v417_v63 = vld [vmem:[%s2924_s2 + $0x18] sm:$0xff] }
 0x2cf   : > { %v2202_v5 = vpop.eup %2201  ;;  %v947_v7 = vmul.f32 1.442695, %v928_v2  ;;  %2217 = vpow2.f32 %v1641_v58  ;;  %v1642_v8 = vmul.f32 -1.442695, %v823_v3  ;;  %v3054_v9 = vpop.f32.mrb[22].mxu1 }
 0x2d0   : > { %v2204_v10 = vpop.eup %2203  ;;  %v762_v13 = vpop.f32.mrb[23].mxu1  ;;  %v973_v14 = vmul.f32 %v2202_v5, %v414_v4 }
 0x2d1   : > { %v2206_v15 = vpop.eup %2205  ;;  %2219 = vpow2.f32 %v947_v7  ;;  %v929_v16 = vmul.f32 0.5, %v2204_v10  ;;  %v824_v17 = vadd.f32 %v3004_v42, %v762_v13 }
 0x2d2   : > { %v884_v20 = vadd.f32 1.0, %v2206_v15  ;;  %2221 = vpow2.f32 %v1642_v8  ;;  %v989_v21 = vadd.f32 %v973_v14, %v793_v11  ;;  %v796_v8 = vadd.f32 %v3050_v62, %v3025_v59  ;;  %v418_v14 = vld [vmem:[%s2924_s2 + $0x20] sm:$0xff] }
 0x2d3   : > { %v2208_v22 = vpop.eup %2207  ;;  %v949_v23 = vmul.f32 1.442695, %v929_v16  ;;  %v1643_v24 = vmul.f32 -1.442695, %v824_v17  ;;  %v3060_v27 = vpop.f32.mrb[24].mxu1 }
 0x2d4   : > { %v2210_v30 = vpop.eup %2209  ;;  %2223 = vrcp.f32 %v884_v20  ;;  %v768_v33 = vpop.f32.mrb[25].mxu1  ;;  %1856 = vmatprep.mubr.f32.mxu0 %v989_v21  ;;  %v974_v34 = vmul.f32 %v2208_v22, %v415_v19  ;;  %v797_v22 = vadd.f32 %v3050_v62, %v3028_v0 }
 0x2d5   : > { %v2212_v36 = vpop.eup %2211  ;;  %2225 = vpow2.f32 %v949_v23  ;;  %v930_v37 = vmul.f32 0.5, %v2210_v30  ;;  %v825_v38 = vadd.f32 %v3004_v42, %v768_v33  ;;  %v419_v33 = vld [vmem:[%s2924_s2 + $0x28] sm:$0xff] }
 0x2d6   : > { %v885_v41 = vadd.f32 1.0, %v2212_v36  ;;  %2227 = vpow2.f32 %v1643_v24  ;;  %v990_v45 = vadd.f32 %v974_v34, %v794_v43 }
 0x2d7   : > { %v2214_v47 = vpop.eup %2213  ;;  %v951_v48 = vmul.f32 1.442695, %v930_v37  ;;  %v1644_v49 = vmul.f32 -1.442695, %v825_v38  ;;  %v3066_v52 = vpop.f32.mrb[26].mxu1 }
 0x2d8   : > { %v2216_v50 = vpop.eup %2215  ;;  %2229 = vrcp.f32 %v885_v41  ;;  %v774_v54 = vpop.f32.mrb[27].mxu1  ;;  %1857 = vmatmul.mubr.f32.vlgmr.msra.gmra.mrb[16].mxu0 %v990_v45  ;;  %v975_v56 = vmul.f32 %v2214_v47, %v416_v40  ;;  %v798_v41 = vadd.f32 %v3050_v62, %v3031_v6  ;;  %v799_v6 = vadd.f32 %v3050_v62, %v3034_v12 }
 0x2d9   : > { %v2218_v57 = vpop.eup %2217  ;;  %2231 = vpow2.f32 %v951_v48  ;;  %v931_v58 = vmul.f32 0.5, %v2216_v50  ;;  %v826_v61 = vadd.f32 %v3004_v42, %v774_v54  ;;  %2035 = vmatpush3.bf16.msra.mxu0 %v2983_v25 }
 0x2da   : > { %v886_v1 = vadd.f32 1.0, %v2218_v57  ;;  %2233 = vpow2.f32 %v1644_v49  ;;  %v991_v2 = vadd.f32 %v975_v56, %v795_v53  ;;  %2037 = vmatprep.subr.bf16.mxu0 %v2986_v29 }
 0x2db   : > { %v2220_v3 = vpop.eup %2219  ;;  %v953_v55 = vmul.f32 1.442695, %v931_v58  ;;  %v1645_v4 = vmul.f32 -1.442695, %v826_v61  ;;  %v3074_v5 = vpop.f32.mrb[28].mxu1 }
 0x2dc   : > { %v2222_v7 = vpop.eup %2221  ;;  %2235 = vrcp.f32 %v886_v1  ;;  %v780_v10 = vpop.f32.mrb[29].mxu1  ;;  %1859 = vmatprep.mubr.f32.mxu0 %v991_v2  ;;  %v976_v11 = vmul.f32 %v2220_v3, %v417_v63  ;;  %v421_v2 = vld [vmem:[%s2924_s2 + $0x38] sm:$0xff] }
 0x2dd   : > { %2237 = vpow2.f32 %v953_v55  ;;  %v887_v25 = vadd.f32 1.0, %v2222_v7  ;;  %v827_v13 = vadd.f32 %v3004_v42, %v780_v10  ;;  %2039 = vmatpush3.bf16.msra.mxu0 %v2986_v29  ;;  %v800_v7 = vadd.f32 %v3050_v62, %v3037_v18 }
 0x2de   : > { %v2224_v15 = vpop.eup %2223  ;;  %2239 = vpow2.f32 %v1645_v4  ;;  %v992_v16 = vadd.f32 %v976_v11, %v796_v8  ;;  %2041 = vmatprep.subr.bf16.mxu0 %v2991_v32  ;;  %v422_v11 = vld [vmem:[%s2924_s2 + $0x40] sm:$0xff]  ;;  %v801_v18 = vadd.f32 %v3050_v62, %v3040_v31 }
 0x2df   : > { %v2226_v17 = vpop.eup %2225  ;;  %v932_v19 = vmul.f32 0.5, %v2224_v15  ;;  %2241 = vrcp.f32 %v887_v25  ;;  %v1646_v59 = vmul.f32 -1.442695, %v827_v13  ;;  %v3082_v20 = vpop.f32.mrb[30].mxu1 }
 0x2e0   : > { %v2228_v21 = vpop.eup %2227  ;;  %v786_v23 = vpop.f32.mrb[31].mxu1  ;;  %1860 = vmatmul.mubr.f32.gmra.mrb[18].mxu0 %v992_v16  ;;  %v977_v24 = vmul.f32 %v2226_v17, %v418_v14 }
 0x2e1   : > { %v955_v29 = vmul.f32 1.442695, %v932_v19  ;;  %v888_v30 = vadd.f32 1.0, %v2228_v21  ;;  %2243 = vpow2.f32 %v1646_v59  ;;  %v828_v43 = vadd.f32 %v3004_v42, %v786_v23  ;;  %2043 = vmatpush3.bf16.msra.mxu0 %v2991_v32  ;;  %v420_v32 = vld [vmem:[%s2924_s2 + $0x30] sm:$0xff]  ;;  %v423_v19 = vld [vmem:[%s2924_s2 + $0x48] sm:$0xff] }
 0x2e2   : > { %v2230_v34 = vpop.eup %2229  ;;  %v993_v36 = vadd.f32 %v977_v24, %v797_v22  ;;  %2045 = vmatprep.subr.bf16.mxu0 %v2995_v35  ;;  %v802_v24 = vadd.f32 %v3050_v62, %v3043_v46  ;;  %v425_v46 = vld [vmem:[%s2924_s2 + $0x58] sm:$0xff] }
 0x2e3   : > { %v2232_v37 = vpop.eup %2231  ;;  %2245 = vpow2.f32 %v955_v29  ;;  %v933_v38 = vmul.f32 0.5, %v2230_v34  ;;  %v1647_v0 = vmul.f32 -1.442695, %v828_v43  ;;  %v424_v29 = vld [vmem:[%s2924_s2 + $0x50] sm:$0xff]  ;;  %v803_v34 = vadd.f32 %v3050_v62, %v3047_v60 }
 0x2e4   : > { %v2234_v40 = vpop.eup %2233  ;;  %2247 = vrcp.f32 %v888_v30  ;;  %1862 = vmatprep.mubr.f32.mxu0 %v993_v36  ;;  %v978_v45 = vmul.f32 %v2232_v37, %v419_v33 }
 0x2e5   : > { %v957_v42 = vmul.f32 1.442695, %v933_v38  ;;  %v889_v47 = vadd.f32 1.0, %v2234_v40  ;;  %2249 = vpow2.f32 %v1647_v0  ;;  %2047 = vmatpush3.bf16.msra.mxu0 %v2995_v35 }
 0x2e6   : > { %v2236_v48 = vpop.eup %2235  ;;  %v994_v49 = vadd.f32 %v978_v45, %v798_v41  ;;  %2049 = vmatprep.subr.bf16.mxu0 %v3000_v39 }
 0x2e7   : > { %v2238_v50 = vpop.eup %2237  ;;  %2251 = vpow2.f32 %v957_v42  ;;  %v934_v53 = vmul.f32 0.5, %v2236_v48  ;;  %v426_v48 = vld [vmem:[%s2924_s2 + $0x60] sm:$0xff] }
 0x2e8   : > { %v2240_v54 = vpop.eup %2239  ;;  %2253 = vrcp.f32 %v889_v47  ;;  %1863 = vmatmul.mubr.f32.gmra.mrb[20].mxu0 %v994_v49  ;;  %v979_v56 = vmul.f32 %v2238_v50, %v420_v32  ;;  %v804_v47 = vadd.f32 %v3050_v62, %v3054_v9  ;;  %v806_v9 = vadd.f32 %v3050_v62, %v3066_v52  ;;  %v1200_v52 = vld [vmem:[#allocation11 + $0x70] sm:$0xff] }
 0x2e9   : > { %v2242_v57 = vpop.eup %2241  ;;  %v959_v58 = vmul.f32 1.442695, %v934_v53  ;;  %v890_v61 = vadd.f32 1.0, %v2240_v54  ;;  %2051 = vmatpush3.bf16.msra.mxu0 %v3000_v39  ;;  %v805_v53 = vadd.f32 %v3050_v62, %v3060_v27 }
 0x2ea   : > { %v935_v35 = vmul.f32 0.5, %v2242_v57  ;;  %v995_v63 = vadd.f32 %v979_v56, %v799_v6  ;;  %2053 = vmatprep.subr.bf16.mxu0 %v3009_v44  ;;  %v427_v6 = vld [vmem:[%s2924_s2 + $0x68] sm:$0xff] }
 0x2eb   : > { %v2244_v1 = vpop.eup %2243  ;;  %2255 = vpow2.f32 %v959_v58 }
 0x2ec   : > { %v961_v3 = vmul.f32 1.442695, %v935_v35  ;;  %2257 = vrcp.f32 %v890_v61  ;;  %v891_v55 = vadd.f32 1.0, %v2244_v1  ;;  %1865 = vmatprep.mubr.f32.mxu0 %v995_v63  ;;  %v428_v61 = vld [vmem:[%s2924_s2 + $0x70] sm:$0xff]  ;;  %v807_v1 = vadd.f32 %v3050_v62, %v3074_v5 }
 0x2ed   : > { %v2246_v12 = vpop.eup %2245  ;;  %2055 = vmatpush3.bf16.msra.mxu0 %v3009_v44  ;;  %v1023_v5 = vsub.s32 3, %v2959_v26 }
 0x2ee   : > { %v2248_v4 = vpop.eup %2247  ;;  %2259 = vpow2.f32 %v961_v3  ;;  %v980_v39 = vmul.f32 %v2246_v12, %v421_v2  ;;  %2057 = vmatprep.subr.bf16.mxu0 %v3016_v51  ;;  %v429_v3 = vld [vmem:[%s2924_s2 + $0x78] sm:$0xff]  ;;  %v808_v12 = vadd.f32 %v3050_v62, %v3082_v20 }
 0x2ef   : > { %v2250_v8 = vpop.eup %2249  ;;  %v936_v10 = vmul.f32 0.5, %v2248_v4  ;;  %2261 = vrcp.f32 %v891_v55 }
 0x2f0   : > { %v892_v25 = vadd.f32 1.0, %v2250_v8  ;;  %v996_v13 = vadd.f32 %v980_v39, %v800_v7  ;;  %v1201_v39 = vld [vmem:[#allocation11 + $0x78] sm:$0xff] }
 0x2f1   : > { %v2252_v14 = vpop.eup %2251  ;;  %v963_v15 = vmul.f32 1.442695, %v936_v10  ;;  %2059 = vmatpush3.bf16.msra.mxu0 %v3016_v51  ;;  %v2060_v8 = vpack.c.bf16 %v1201_v39, %v1200_v52  ;;  %v1024_v10 = vrot.slane %v2965_v28, %v1023_v5 }
 0x2f2   : > { %v2254_v44 = vpop.eup %2253  ;;  %2263 = vrcp.f32 %v892_v25  ;;  %1866 = vmatmul.mubr.f32.gmra.mrb[22].mxu0 %v996_v13  ;;  %v981_v16 = vmul.f32 %v2252_v14, %v422_v11 }
 0x2f3   : > { %2265 = vpow2.f32 %v963_v15  ;;  %v937_v17 = vmul.f32 0.5, %v2254_v44  ;;  %2061 = vmatprep.subr.bf16.mxu0 %v2060_v8  ;;  %2071 = vmatprep.subr.bf16.mxu1 %v2060_v8 }
 0x2f4   : > { %v997_v59 = vadd.f32 %v981_v16, %v801_v18  ;;  %2079 = vmatpush3.bf16.msra.mxu1 %v2060_v8 }
 0x2f5   : > { %v2256_v21 = vpop.eup %2255  ;;  %v965_v22 = vmul.f32 1.442695, %v937_v17  ;;  %2063 = vmatpush3.bf16.msra.mxu0 %v2060_v8 }
 0x2f6   : > { %v2258_v23 = vpop.eup %2257  ;;  %1868 = vmatprep.mubr.f32.mxu0 %v997_v59  ;;  %v982_v51 = vmul.f32 %v2256_v21, %v423_v19 }
 0x2f7   : > { %2267 = vpow2.f32 %v965_v22  ;;  %v938_v30 = vmul.f32 0.5, %v2258_v23 }
 0x2f8   : > { %v2260_v31 = vpop.eup %2259  ;;  %v998_v43 = vadd.f32 %v982_v51, %v802_v24 }
 0x2f9   : > { %v2262_v33 = vpop.eup %2261  ;;  %v967_v36 = vmul.f32 1.442695, %v938_v30  ;;  %v983_v37 = vmul.f32 %v2260_v31, %v424_v29 }
 0x2fa   : > { %v939_v38 = vmul.f32 0.5, %v2262_v33  ;;  %1869 = vmatmul.mubr.f32.gmra.mrb[24].mxu0 %v998_v43 }
 0x2fb   : > { %2269 = vpow2.f32 %v967_v36  ;;  %v999_v0 = vadd.f32 %v983_v37, %v803_v34 }
 0x2fc   : > { %v2264_v40 = vpop.eup %2263  ;;  %v969_v41 = vmul.f32 1.442695, %v939_v38 }
 0x2fd   : > { %v2266_v45 = vpop.eup %2265  ;;  %v940_v42 = vmul.f32 0.5, %v2264_v40  ;;  %1871 = vmatprep.mubr.f32.mxu0 %v999_v0 }
 0x2fe   : > { %2271 = vpow2.f32 %v969_v41  ;;  %v984_v60 = vmul.f32 %v2266_v45, %v425_v46 }
 0x2ff   : > { %v971_v32 = vmul.f32 1.442695, %v940_v42 }
 0x300   : > { %v1000_v49 = vadd.f32 %v984_v60, %v804_v47 }
 0x301   : > { %v2268_v50 = vpop.eup %2267  ;;  %2273 = vpow2.f32 %v971_v32 }
 0x302   : > { %1872 = vmatmul.mubr.f32.gmra.mrb[26].mxu0 %v1000_v49  ;;  %v985_v54 = vmul.f32 %v2268_v50, %v426_v48 }
 0x304   : > { %v1001_v56 = vadd.f32 %v985_v54, %v805_v53 }
 0x305   : > { %v2270_v57 = vpop.eup %2269 }
 0x306   : > { %1874 = vmatprep.mubr.f32.mxu0 %v1001_v56  ;;  %v986_v58 = vmul.f32 %v2270_v57, %v427_v6 }
 0x308   : > { %v2272_v35 = vpop.eup %2271  ;;  %v1002_v63 = vadd.f32 %v986_v58, %v806_v9 }
 0x309   : > { %v987_v2 = vmul.f32 %v2272_v35, %v428_v61  ;;  %v1204_v35 = vsub.s32 4, %v2959_v26 }
 0x30a   : > { %1875 = vmatmul.mubr.f32.gmra.mrb[28].mxu0 %v1002_v63  ;;  %v2339_v63 = vld [vmem:[%s3228_s6] sm:$0xff] }
 0x30b   : > { %v2274_v27 = vpop.eup %2273  ;;  %v1003_v55 = vadd.f32 %v987_v2, %v807_v1  ;;  %v3135_v1 = vrot.slane %v2339_v63, %v1204_v35 }
 0x30c   : > { %v988_v4 = vmul.f32 %v2274_v27, %v429_v3 }
 0x30d   : > { %1877 = vmatprep.mubr.f32.mxu0 %v1003_v55 }
 0x30e   : > { %v1004_v7 = vadd.f32 %v988_v4, %v808_v12 }
 0x310   : > { %1878 = vmatmul.mubr.f32.gmra.mrb[30].mxu0 %v1004_v7 }
 0x3ab   : > { %v1858_v11 = vpop.f32.mrb[16].mxu0 }
 0x3ac   : > { %v1097_v25 = vadd.f32 %v1858_v11, %v1024_v10  ;;  %v1091_v13 = vpop.f32.mrb[17].mxu0 }
 0x3ad   : > { %v1092_v14 = vadd.f32 %v1091_v13, %v1024_v10 }
 0x3ae   : > { %v1171_v20 = vmax.f32 %v1097_v25, 0.0 }
 0x3af   : > { %v1170_v62 = vmax.f32 %v1092_v14, 0.0 }
 0x3b1   : > { %1912 = vmatprep.mubr.f32.mxu0 %v1170_v62 }
 0x3b2   : > { %1913 = vmatmul.mubr.f32.vlgmr.msra.gmra.mrb[32].mxu0 %v1171_v20 }
 0x3b3   : > { %v1861_v15 = vpop.f32.mrb[18].mxu0 }
 0x3b4   : > { %v1107_v44 = vadd.f32 %v1861_v15, %v1024_v10  ;;  %v1101_v18 = vpop.f32.mrb[19].mxu0 }
 0x3b5   : > { %v1102_v16 = vadd.f32 %v1101_v18, %v1024_v10 }
 0x3b6   : > { %v1173_v19 = vmax.f32 %v1107_v44, 0.0 }
 0x3b7   : > { %v1172_v17 = vmax.f32 %v1102_v16, 0.0 }
 0x3b9   : > { %1915 = vmatprep.mubr.f32.mxu0 %v1172_v17 }
 0x3ba   : > { %1916 = vmatmul.mubr.f32.gmra.mrb[34].mxu0 %v1173_v19 }
 0x3bb   : > { %v1864_v59 = vpop.f32.mrb[20].mxu0 }
 0x3bc   : > { %v1117_v21 = vadd.f32 %v1864_v59, %v1024_v10  ;;  %v1111_v22 = vpop.f32.mrb[21].mxu0 }
 0x3bd   : > { %v1112_v28 = vadd.f32 %v1111_v22, %v1024_v10 }
 0x3be   : > { %v1175_v24 = vmax.f32 %v1117_v21, 0.0 }
 0x3bf   : > { %v1174_v23 = vmax.f32 %v1112_v28, 0.0 }
 0x3c1   : > { %1918 = vmatprep.mubr.f32.mxu0 %v1174_v23 }
 0x3c2   : > { %1919 = vmatmul.mubr.f32.gmra.mrb[36].mxu0 %v1175_v24 }
 0x3c5   : > { %v1867_v51 = vpop.f32.mrb[22].mxu0 }
 0x3c6   : > { %v1127_v29 = vadd.f32 %v1867_v51, %v1024_v10  ;;  %v1121_v30 = vpop.f32.mrb[23].mxu0 }
 0x3c7   : > { %v1122_v31 = vadd.f32 %v1121_v30, %v1024_v10 }
 0x3c8   : > { %v1177_v33 = vmax.f32 %v1127_v29, 0.0 }
 0x3c9   : > { %v1176_v43 = vmax.f32 %v1122_v31, 0.0 }
 0x3cb   : > { %1921 = vmatprep.mubr.f32.mxu0 %v1176_v43 }
 0x3cc   : > { %1922 = vmatmul.mubr.f32.gmra.mrb[38].mxu0 %v1177_v33 }
 0x3cd   : > { %v1870_v34 = vpop.f32.mrb[24].mxu0 }
 0x3ce   : > { %v1137_v36 = vadd.f32 %v1870_v34, %v1024_v10  ;;  %v1131_v37 = vpop.f32.mrb[25].mxu0 }
 0x3cf   : > { %v1132_v38 = vadd.f32 %v1131_v37, %v1024_v10 }
 0x3d0   : > { %v1179_v46 = vmax.f32 %v1137_v36, 0.0 }
 0x3d1   : > { %v1178_v0 = vmax.f32 %v1132_v38, 0.0 }
 0x3d3   : > { %1924 = vmatprep.mubr.f32.mxu1 %v1178_v0 }
 0x3d4   : > { %1925 = vmatmul.mubr.f32.vlgmr.msra.gmra.mrb[32].mxu1 %v1179_v46 }
 0x3d5   : > { %v1873_v40 = vpop.f32.mrb[26].mxu0 }
 0x3d6   : > { %v1147_v41 = vadd.f32 %v1873_v40, %v1024_v10  ;;  %v1141_v45 = vpop.f32.mrb[27].mxu0 }
 0x3d7   : > { %v1142_v42 = vadd.f32 %v1141_v45, %v1024_v10 }
 0x3d8   : > { %v1181_v60 = vmax.f32 %v1147_v41, 0.0 }
 0x3d9   : > { %v1180_v47 = vmax.f32 %v1142_v42, 0.0 }
 0x3db   : > { %1927 = vmatprep.mubr.f32.mxu1 %v1180_v47 }
 0x3dc   : > { %1928 = vmatmul.mubr.f32.gmra.mrb[34].mxu1 %v1181_v60 }
 0x3dd   : > { %v1876_v32 = vpop.f32.mrb[28].mxu0 }
 0x3de   : > { %v1157_v48 = vadd.f32 %v1876_v32, %v1024_v10  ;;  %v1151_v49 = vpop.f32.mrb[29].mxu0 }
 0x3df   : > { %v1152_v50 = vadd.f32 %v1151_v49, %v1024_v10 }
 0x3e0   : > { %v1183_v54 = vmax.f32 %v1157_v48, 0.0 }
 0x3e1   : > { %v1182_v53 = vmax.f32 %v1152_v50, 0.0 }
 0x3e3   : > { %1930 = vmatprep.mubr.f32.mxu1 %v1182_v53  ;;  %v1879_v6 = vpop.f32.mrb[30].mxu0 }
 0x3e4   : > { %1931 = vmatmul.mubr.f32.gmra.mrb[36].mxu1 %v1183_v54  ;;  %v1167_v56 = vadd.f32 %v1879_v6, %v1024_v10  ;;  %v1161_v57 = vpop.f32.mrb[31].mxu0 }
 0x3e5   : > { %v1162_v9 = vadd.f32 %v1161_v57, %v1024_v10 }
 0x3e6   : > { %v1185_v61 = vmax.f32 %v1167_v56, 0.0 }
 0x3e7   : > { %v1184_v58 = vmax.f32 %v1162_v9, 0.0 }
 0x3e9   : > { %1933 = vmatprep.mubr.f32.mxu1 %v1184_v58 }
 0x3ea   : > { %1934 = vmatmul.mubr.f32.gmra.mrb[38].mxu1 %v1185_v61 }
 0x485   : > { %v1914_v2 = vpop.f32.mrb[32].mxu0 }
 0x486   : > { %v1278_v3 = vadd.f32 %v1914_v2, %v3135_v1  ;;  %v1272_v27 = vpop.f32.mrb[33].mxu0 }
 0x487   : > { %v1273_v55 = vadd.f32 %v1272_v27, %v3135_v1 }
 0x488   : > { %v1649_v12 = vmul.f32 -1.442695, %v1278_v3 }
 0x489   : > { %v1648_v4 = vmul.f32 -1.442695, %v1273_v55 }
 0x48a   : > { %2275 = vpow2.f32 %v1649_v12 }
 0x48b   : > { %2277 = vpow2.f32 %v1648_v4 }
 0x48d   : > { %v1917_v7 = vpop.f32.mrb[34].mxu0 }
 0x48e   : > { %v1288_v52 = vadd.f32 %v1917_v7, %v3135_v1  ;;  %v1282_v26 = vpop.f32.mrb[35].mxu0 }
 0x48f   : > { %v1283_v39 = vadd.f32 %v1282_v26, %v3135_v1 }
 0x490   : > { %v1651_v8 = vmul.f32 -1.442695, %v1288_v52 }
 0x491   : > { %v1650_v5 = vmul.f32 -1.442695, %v1283_v39 }
 0x492   : > { %2279 = vpow2.f32 %v1651_v8 }
 0x493   : > { %2281 = vpow2.f32 %v1650_v5 }
 0x494   : > { %v2276_v10 = vpop.eup %2275 }
 0x495   : > { %v2278_v11 = vpop.eup %2277  ;;  %v1400_v25 = vadd.f32 1.0, %v2276_v10  ;;  %v1920_v13 = vpop.f32.mrb[36].mxu0 }
 0x496   : > { %v1399_v14 = vadd.f32 1.0, %v2278_v11  ;;  %v1298_v62 = vadd.f32 %v1920_v13, %v3135_v1  ;;  %v1292_v20 = vpop.f32.mrb[37].mxu0 }
 0x497   : > { %2283 = vrcp.f32 %v1400_v25  ;;  %v1293_v15 = vadd.f32 %v1292_v20, %v3135_v1 }
 0x498   : > { %2285 = vrcp.f32 %v1399_v14  ;;  %v1653_v44 = vmul.f32 -1.442695, %v1298_v62 }
 0x499   : > { %v1652_v18 = vmul.f32 -1.442695, %v1293_v15 }
 0x49a   : > { %2287 = vpow2.f32 %v1653_v44 }
 0x49b   : > { %2289 = vpow2.f32 %v1652_v18 }
 0x49c   : > { %v2280_v16 = vpop.eup %2279 }
 0x49d   : > { %v2282_v17 = vpop.eup %2281  ;;  %v1402_v19 = vadd.f32 1.0, %v2280_v16 }
 0x49e   : > { %v1401_v59 = vadd.f32 1.0, %v2282_v17 }
 0x49f   : > { %2291 = vrcp.f32 %v1402_v19  ;;  %v1923_v21 = vpop.f32.mrb[38].mxu0 }
 0x4a0   : > { %2293 = vrcp.f32 %v1401_v59  ;;  %v1308_v22 = vadd.f32 %v1923_v21, %v3135_v1  ;;  %v1302_v28 = vpop.f32.mrb[39].mxu0 }
 0x4a1   : > { %v2284_v23 = vpop.eup %2283  ;;  %v1303_v24 = vadd.f32 %v1302_v28, %v3135_v1 }
 0x4a2   : > { %v2286_v51 = vpop.eup %2285  ;;  %1448 = vst [vmem:[%s3146_s22 + $0x8] sm:$0xff] %v2284_v23  ;;  %v1655_v29 = vmul.f32 -1.442695, %v1308_v22 }
 0x4a3   : > { %1447 = vst [vmem:[%s3146_s22] sm:$0xff] %v2286_v51  ;;  %v1654_v30 = vmul.f32 -1.442695, %v1303_v24 }
 0x4a4   : > { %v2288_v31 = vpop.eup %2287  ;;  %2295 = vpow2.f32 %v1655_v29 }
 0x4a5   : > { %v2290_v43 = vpop.eup %2289  ;;  %v1404_v33 = vadd.f32 1.0, %v2288_v31  ;;  %2297 = vpow2.f32 %v1654_v30 }
 0x4a6   : > { %v1403_v34 = vadd.f32 1.0, %v2290_v43 }
 0x4a7   : > { %2299 = vrcp.f32 %v1404_v33  ;;  %v1926_v36 = vpop.f32.mrb[32].mxu1 }
 0x4a8   : > { %2301 = vrcp.f32 %v1403_v34  ;;  %v1318_v37 = vadd.f32 %v1926_v36, %v3135_v1  ;;  %v1312_v38 = vpop.f32.mrb[33].mxu1 }
 0x4a9   : > { %v2292_v0 = vpop.eup %2291  ;;  %v1313_v46 = vadd.f32 %v1312_v38, %v3135_v1 }
 0x4aa   : > { %v2294_v40 = vpop.eup %2293  ;;  %1450 = vst [vmem:[%s3146_s22 + $0x18] sm:$0xff] %v2292_v0  ;;  %v1657_v41 = vmul.f32 -1.442695, %v1318_v37 }
 0x4ab   : > { %1449 = vst [vmem:[%s3146_s22 + $0x10] sm:$0xff] %v2294_v40  ;;  %v1656_v45 = vmul.f32 -1.442695, %v1313_v46 }
 0x4ac   : > { %2303 = vpow2.f32 %v1657_v41 }
 0x4ad   : > { %2305 = vpow2.f32 %v1656_v45 }
 0x4ae   : > { %v2296_v42 = vpop.eup %2295 }
 0x4af   : > { %v2298_v47 = vpop.eup %2297  ;;  %v1406_v60 = vadd.f32 1.0, %v2296_v42  ;;  %v1929_v32 = vpop.f32.mrb[34].mxu1 }
 0x4b0   : > { %v1405_v48 = vadd.f32 1.0, %v2298_v47  ;;  %v1328_v49 = vadd.f32 %v1929_v32, %v3135_v1  ;;  %v1322_v50 = vpop.f32.mrb[35].mxu1 }
 0x4b1   : > { %v2300_v53 = vpop.eup %2299  ;;  %2307 = vrcp.f32 %v1406_v60  ;;  %v1323_v54 = vadd.f32 %v1322_v50, %v3135_v1 }
 0x4b2   : > { %v2302_v6 = vpop.eup %2301  ;;  %1452 = vst [vmem:[%s3146_s22 + $0x28] sm:$0xff] %v2300_v53  ;;  %2309 = vrcp.f32 %v1405_v48  ;;  %v1659_v56 = vmul.f32 -1.442695, %v1328_v49 }
 0x4b3   : > { %1451 = vst [vmem:[%s3146_s22 + $0x20] sm:$0xff] %v2302_v6  ;;  %v1658_v57 = vmul.f32 -1.442695, %v1323_v54 }
 0x4b4   : > { %2311 = vpow2.f32 %v1659_v56 }
 0x4b5   : > { %2313 = vpow2.f32 %v1658_v57 }
 0x4b6   : > { %v2304_v9 = vpop.eup %2303 }
 0x4b7   : > { %v2306_v58 = vpop.eup %2305  ;;  %v1408_v61 = vadd.f32 1.0, %v2304_v9  ;;  %v1932_v35 = vpop.f32.mrb[36].mxu1 }
 0x4b8   : > { %v1407_v63 = vadd.f32 1.0, %v2306_v58  ;;  %v1338_v2 = vadd.f32 %v1932_v35, %v3135_v1  ;;  %v1332_v3 = vpop.f32.mrb[37].mxu1 }
 0x4b9   : > { %2315 = vrcp.f32 %v1408_v61  ;;  %v1333_v27 = vadd.f32 %v1332_v3, %v3135_v1 }
 0x4ba   : > { %2317 = vrcp.f32 %v1407_v63  ;;  %v1661_v55 = vmul.f32 -1.442695, %v1338_v2 }
 0x4bb   : > { %v2308_v12 = vpop.eup %2307  ;;  %v1660_v4 = vmul.f32 -1.442695, %v1333_v27 }
 0x4bc   : > { %v2310_v7 = vpop.eup %2309  ;;  %1454 = vst [vmem:[%s3146_s22 + $0x38] sm:$0xff] %v2308_v12  ;;  %2319 = vpow2.f32 %v1661_v55 }
 0x4bd   : > { %1453 = vst [vmem:[%s3146_s22 + $0x30] sm:$0xff] %v2310_v7  ;;  %2321 = vpow2.f32 %v1660_v4  ;;  %v1935_v52 = vpop.f32.mrb[38].mxu1 }
 0x4be   : > { %v2312_v26 = vpop.eup %2311  ;;  %v1348_v39 = vadd.f32 %v1935_v52, %v3135_v1  ;;  %v1342_v8 = vpop.f32.mrb[39].mxu1 }
 0x4bf   : > { %v2314_v5 = vpop.eup %2313  ;;  %v1410_v10 = vadd.f32 1.0, %v2312_v26  ;;  %v1343_v11 = vadd.f32 %v1342_v8, %v3135_v1 }
 0x4c0   : > { %v1409_v25 = vadd.f32 1.0, %v2314_v5  ;;  %v1663_v13 = vmul.f32 -1.442695, %v1348_v39 }
 0x4c1   : > { %2323 = vrcp.f32 %v1410_v10  ;;  %v1662_v14 = vmul.f32 -1.442695, %v1343_v11 }
 0x4c2   : > { %2325 = vrcp.f32 %v1409_v25 }
 0x4c3   : > { %v2316_v62 = vpop.eup %2315  ;;  %2327 = vpow2.f32 %v1663_v13 }
 0x4c4   : > { %v2318_v20 = vpop.eup %2317  ;;  %1456 = vst [vmem:[%s3146_s22 + $0x48] sm:$0xff] %v2316_v62  ;;  %2329 = vpow2.f32 %v1662_v14 }
 0x4c5   : > { %1455 = vst [vmem:[%s3146_s22 + $0x40] sm:$0xff] %v2318_v20 }
 0x4c6   : > { %v2320_v15 = vpop.eup %2319 }
 0x4c7   : > { %v2322_v44 = vpop.eup %2321  ;;  %v1412_v18 = vadd.f32 1.0, %v2320_v15 }
 0x4c8   : > { %v1411_v16 = vadd.f32 1.0, %v2322_v44 }
 0x4c9   : > { %2331 = vrcp.f32 %v1412_v18 }
 0x4ca   : > { %2333 = vrcp.f32 %v1411_v16 }
 0x4cb   : > { %v2324_v1 = vpop.eup %2323 }
 0x4cc   : > { %v2326_v17 = vpop.eup %2325  ;;  %1458 = vst [vmem:[%s3146_s22 + $0x58] sm:$0xff] %v2324_v1 }
 0x4cd   : > { %v2328_v19 = vpop.eup %2327  ;;  %1457 = vst [vmem:[%s3146_s22 + $0x50] sm:$0xff] %v2326_v17 }
 0x4ce   : > { %v2330_v59 = vpop.eup %2329  ;;  %v1414_v21 = vadd.f32 1.0, %v2328_v19 }
 0x4cf   : > { %v1413_v22 = vadd.f32 1.0, %v2330_v59 }
 0x4d0   : > { %2335 = vrcp.f32 %v1414_v21 }
 0x4d1   : > { %2337 = vrcp.f32 %v1413_v22 }
 0x4d3   : > { %v2332_v28 = vpop.eup %2331 }
 0x4d4   : > { %v2334_v23 = vpop.eup %2333  ;;  %1460 = vst [vmem:[%s3146_s22 + $0x68] sm:$0xff] %v2332_v28 }
 0x4d5   : > { %1459 = vst [vmem:[%s3146_s22 + $0x60] sm:$0xff] %v2334_v23 }
 0x4da   : > { %v2336_v24 = vpop.eup %2335 }
 0x4db   : > { %v2338_v51 = vpop.eup %2337  ;;  %1462 = vst [vmem:[%s3146_s22 + $0x78] sm:$0xff] %v2336_v24 }
 0x4dc   : > { %1461 = vst [vmem:[%s3146_s22 + $0x70] sm:$0xff] %v2338_v51 }
 0x4dd   : > { %2525 = shalt.err (!%p2522_p2)
}
 0x4de   : > { %s2526_s29 = scalar_lea.hbm %s3175_s14, 2048  ;;  %s2530_s2 = scalar_lea.hbm %s3229_s7, 8192 }
 0x4df   : > { %p2527_p10 = scmp.ne.s32.totalorder %s3175_s14, %s2526_s29  ;;  %p2531_p7 = scmp.lt.u32.totalorder %s3175_s14, %s3229_s7 }
 0x4e0   : > { %p2532_p9 = scmp.lt.u32.totalorder %s2530_s2, %s2526_s29  ;;  %p2534_p5 = scmp.lt.u32.totalorder %s2526_s29, %s3175_s14 }
 0x4e1   : > { %p2528_p13 = pnand %p2527_p10, %p2817_p8 }
 0x4e2   : > { %p2533_p12 = por %p2532_p9, %p2531_p7 }
 0x4e3   : > { %p2529_p3 = pneg %p2528_p13 }
 0x4e4   : > { %p2535_p1 = por %p2534_p5, %p2533_p12 }
 0x4e6   : > { %p2536_p4 = pnand %p2535_p1, %p2529_p3 }
 0x4e8   : > { %2539 = shalt.err (!%p2536_p4)
}
 0x4e9   : > { %s2608_s11 = smov 128   ;;  %s2609_s19 = smov 8  }
 0x4ea   : > { %2100 = dma.vmem_to_hbm [thread:$0]  (%p2817_p8), %s3177_s5, 2048, %s3175_s14, %s1464_s13, %s2608_s11, %s2608_s11, %s2609_s19  }
 0x4eb PF: > { %p2135_p6 = scmp.ge.s32.totalorder %s2594_s27, 2  ;;  %s1492_s22 = sand.u32 1, %s2582_s24  }
 0x4ec   : > { %p3264_p11 = scmp.ne.s32.totalorder %s3242_s8, 0  ;;  %s1493_s21 = scalar_lea.sflag [#allocation4], %s1492_s22 }
 0x4ee   : > { %p2123_p0 = pnand %p2135_p6, %p3264_p11 }
 0x4f0   : > { %2577 = dma.done.wait (!%p2123_p0), %s1493_s21, 2048  }
 0x4f1   : > { %2579 = vsyncadd (!%p2123_p0), %s1493_s21, 4294965248  ;;  %s3265_s17 = sld [smem:[#allocation20_spill]]  ;;  %p25_p2 = scmp.ge.s32.totalorder %s2804_s12, 6  }
 0x4f2   : > { %s3266_s24 = smov %s2586_s25  ;;  %s3267_s25 = smov %s2590_s26 }
 0x4f3   : > { %s3269_s27 = smov %s2804_s12  ;;  %27 = sbr.rel (!%p25_p2) target bundleno = 14 (0xe), region = 122 }
 0x4f7   : > { %s3268_s26 = smov %s3265_s17 }
 0x4fa   :  { %1498 = vsyncpa [#allocation3], 1 }
 0x4fb   :  { %1500 = vsyncpa [#allocation3 + $0x1], 1 }
 0x4fc   :  { %1501 = vsyncpa [#allocation6], 1 }
 0x4fd   :  { %1503 = vsyncpa [#allocation6 + $0x1], 1 }
 0x4fe   :  { %1504 = vsyncpa [#allocation9], 1 }
 0x4ff   :  { %1505 = vsyncpa [#allocation12], 1 }
 0x500   :  { %1506 = vsyncpa [#allocation4], 1 }
 0x501   :  { %1508 = vsyncpa [#allocation4 + $0x1], 1 }

</bundles_post_ra>
